<compile_context>
chip_gen: v7x
topology: tpu7x:2x2x1
jax: 0.10.0
libtpu: 0.0.40
codegen_flags: <defaults>
</compile_context>

<pallas_src>
import functools
import math

import jax
import jax.numpy as jnp
from jax.experimental import pallas as pl
from jax.experimental.pallas import tpu as pltpu


# ----------------------------------------------------------------------------
# Parameter slab layout (width-32 slab): (Din, 32) weights stacked along rows,
# then (1, 32) bias / LayerNorm rows. All offsets are static Python ints.
# ----------------------------------------------------------------------------
def _w32_layout(D, dff):
    entries = [("enc_wq", D), ("enc_wk", D), ("enc_wv", D), ("enc_wo", D),
               ("enc_w2", dff),
               ("task_w", D), ("ff_w", D),
               ("dsa_wq", D), ("dsa_wk", D), ("dsa_wv", D), ("dsa_wo", D),
               ("dca_wq", D), ("dca_wk", D), ("dca_wv", D), ("dca_wo", D),
               ("dec_w2", dff)]
    vec_names = ["enc_bq", "enc_bk", "enc_bv", "enc_bo", "enc_b2",
                 "enc_ln1_g", "enc_ln1_b", "enc_ln2_g", "enc_ln2_b",
                 "task_b", "ff_b",
                 "dsa_bq", "dsa_bk", "dsa_bv", "dsa_bo",
                 "dca_bq", "dca_bk", "dca_bv", "dca_bo",
                 "dec_b2",
                 "dec_ln1_g", "dec_ln1_b", "dec_ln2_g", "dec_ln2_b",
                 "dec_ln3_g", "dec_ln3_b"]
    entries += [(n, 1) for n in vec_names]
    off, rows, r = {}, {}, 0
    for name, h in entries:
        off[name] = r
        rows[name] = h
        r += h
    total = ((r + 7) // 8) * 8          # pad rows to a sublane multiple
    return off, rows, total


# ----------------------------------------------------------------------------
# Fused gazeformer kernel: encoder layer + task cond + decoder layer + heads.
# Runs once per batch element (grid=(N,), "parallel").
# ----------------------------------------------------------------------------
def _gazeformer_kernel(src_ref, aux_ref, ppos_ref, qpos_ref,
                       w32_ref, w64_ref, head_ref, out_ref,
                       *, S, L, D, dff, off32):
    scale = 1.0 / math.sqrt(D)

    def W(name):                                  # (D, D) weight slice
        o = off32[name]
        return w32_ref[o:o + D, :]

    def W2(name):                                 # (dff, D) FFN-out weight
        o = off32[name]
        return w32_ref[o:o + dff, :]

    def V(name):                                  # (1, D) bias / LN row
        o = off32[name]
        return w32_ref[o:o + 1, :]

    def lin(x, wname, bname):
        return jnp.dot(x, W(wname), preferred_element_type=jnp.float32) + V(bname)

    def attn(q, k, v):
        s = jnp.einsum("qd,kd->qk", q, k,
                       preferred_element_type=jnp.float32) * scale
        s = s - jnp.max(s, axis=-1, keepdims=True)
        e = jnp.exp(s)
        p = e * pl.reciprocal(jnp.sum(e, axis=-1, keepdims=True), approx=True)
        return jnp.dot(p, v, preferred_element_type=jnp.float32)

    def layernorm(x, gname, bname, eps=1e-5):
        m = jnp.mean(x, axis=-1, keepdims=True)
        var = jnp.mean(jnp.square(x - m), axis=-1, keepdims=True)
        return (x - m) * jax.lax.rsqrt(var + eps) * V(gname) + V(bname)

    src = src_ref[...]                  # (S, D) image-patch tokens (one batch)
    ppos = ppos_ref[...]                # (S, D) sine patch positional embedding
    qpos = qpos_ref[...]                # (L, D) learned query positional embedding
    aux = aux_ref[...]                  # (16, D): row0=firstfix sine, row1=task, rows2..=eps
    first = aux[0:1, :]                 # (1, D)
    task = aux[1:2, :]                  # (1, D)
    eps3 = aux[2:2 + L, 0:3]            # (L, 3) reparameterization noise

    # ------------------------- encoder layer ------------------------------
    sp = src + ppos
    q = lin(sp, "enc_wq", "enc_bq")
    k = lin(sp, "enc_wk", "enc_bk")
    v = lin(src, "enc_wv", "enc_bv")
    a = lin(attn(q, k, v), "enc_wo", "enc_bo")
    x1 = layernorm(src + a, "enc_ln1_g", "enc_ln1_b")
    h = jnp.maximum(
        jnp.dot(x1, w64_ref[0:D, :], preferred_element_type=jnp.float32)
        + w64_ref[2 * D:2 * D + 1, :], 0.0)
    ff = jnp.dot(h, W2("enc_w2"), preferred_element_type=jnp.float32) + V("enc_b2")
    mem = layernorm(x1 + ff, "enc_ln2_g", "enc_ln2_b")
    # task conditioning: projected task embedding broadcast over memory tokens
    mem = mem + lin(task, "task_w", "task_b")

    # ------------------------- decoder layer ------------------------------
    # query sequence: slot 0 = firstfix projection, remaining slots zero
    firstfix = lin(first, "ff_w", "ff_b")                      # (1, D)
    row = jax.lax.broadcasted_iota(jnp.int32, (L, D), 0)
    tgt = jnp.where(row == 0, jnp.broadcast_to(firstfix, (L, D)), 0.0)

    # self-attention over query slots
    tp = tgt + qpos
    q = lin(tp, "dsa_wq", "dsa_bq")
    k = lin(tp, "dsa_wk", "dsa_bk")
    v = lin(tgt, "dsa_wv", "dsa_bv")
    sa = lin(attn(q, k, v), "dsa_wo", "dsa_bo")
    y1 = layernorm(tgt + sa, "dec_ln1_g", "dec_ln1_b")

    # cross-attention to encoder memory (patch positions added to keys)
    qc = lin(y1 + qpos, "dca_wq", "dca_bq")
    kc = lin(mem + ppos, "dca_wk", "dca_bk")
    vc = lin(mem, "dca_wv", "dca_bv")
    ca = lin(attn(qc, kc, vc), "dca_wo", "dca_bo")
    y2 = layernorm(y1 + ca, "dec_ln2_g", "dec_ln2_b")

    # FFN
    h = jnp.maximum(
        jnp.dot(y2, w64_ref[D:2 * D, :], preferred_element_type=jnp.float32)
        + w64_ref[2 * D + 1:2 * D + 2, :], 0.0)
    ff = jnp.dot(h, W2("dec_w2"), preferred_element_type=jnp.float32) + V("dec_b2")
    outs = layernorm(y2 + ff, "dec_ln3_g", "dec_ln3_b")        # (L, D)

    # dropout: eval mode -> identity

    # ---------------- fused output heads (128-lane padded) ----------------
    # columns: [token(2) | y_mu x_mu t_mu | y_lv x_lv t_lv | zero-pad...]
    hh = (jnp.dot(outs, head_ref[0:D, :], preferred_element_type=jnp.float32)
          + head_ref[D:D + 1, :])                              # (L, 128)
    logits = hh[:, 0:2]
    mu = hh[:, 2:5]
    logvar = hh[:, 5:8]
    logits = logits - jnp.max(logits, axis=-1, keepdims=True)
    logp = logits - jnp.log(jnp.sum(jnp.exp(logits), axis=-1, keepdims=True))
    yxt = jnp.maximum(mu + eps3 * jnp.exp(0.5 * logvar), 0.0)  # relu(reparam)

    out_ref[...] = jnp.zeros_like(out_ref)
    out_ref[:, 0:2] = logp
    out_ref[:, 2:5] = yxt


# ----------------------------------------------------------------------------
# Cost estimate (helps XLA overlap the wrapper-side gather / transpose)
# ----------------------------------------------------------------------------
def _cost_estimate(N, S, L, D, dff, p):
    mm = lambda m, k, n: 2 * m * k * n
    enc = (4 * mm(S, D, D) + 2 * mm(S, S, D)
           + mm(S, D, dff) + mm(S, dff, D) + mm(1, D, D))
    dec = (mm(1, D, D) + 4 * mm(L, D, D) + 2 * mm(L, L, D)
           + 2 * mm(L, D, D) + 2 * mm(S, D, D) + 2 * mm(L, S, D)
           + mm(L, D, dff) + mm(L, dff, D) + mm(L, D, 128))
    flops = N * (enc + dec)
    transcendentals = N * (S * S + L * L + L * S + 10 * L)
    param_bytes = 4 * (p["w32"].size + p["w64"].size + p["head"].size
                       + p["patchpos"].size + p["querypos"].size)
    act_bytes = 4 * (N * S * D + N * 16 * D + N * L * 128)
    return pl.CostEstimate(flops=flops, transcendentals=transcendentals,
                           bytes_accessed=param_bytes + act_bytes)


# ----------------------------------------------------------------------------
# PositionEmbeddingSine2d (DETR-style), pure parameter setup (plain JAX glue)
# ----------------------------------------------------------------------------
def sine_pos_embed_2d(h, w, hidden_dim, normalize=True, temperature=10000.0):
    num_pos_feats = hidden_dim // 2
    eps = 1e-6
    scale = 2.0 * math.pi
    y_embed = jnp.arange(1, h + 1, dtype=jnp.float32)[:, None] * jnp.ones((1, w), jnp.float32)
    x_embed = jnp.ones((h, 1), jnp.float32) * jnp.arange(1, w + 1, dtype=jnp.float32)[None, :]
    if normalize:
        y_embed = y_embed / (y_embed[-1:, :] + eps) * scale
        x_embed = x_embed / (x_embed[:, -1:] + eps) * scale
    dim_t = jnp.arange(num_pos_feats, dtype=jnp.float32)
    dim_t = temperature ** (2.0 * jnp.floor(dim_t / 2.0) / num_pos_feats)
    pos_x = x_embed[:, :, None] / dim_t
    pos_y = y_embed[:, :, None] / dim_t
    pos_x = jnp.stack([jnp.sin(pos_x[:, :, 0::2]), jnp.cos(pos_x[:, :, 1::2])],
                      axis=3).reshape(h, w, -1)
    pos_y = jnp.stack([jnp.sin(pos_y[:, :, 0::2]), jnp.cos(pos_y[:, :, 1::2])],
                      axis=3).reshape(h, w, -1)
    return jnp.concatenate([pos_y, pos_x], axis=-1)     # (h, w, hidden_dim)


# ----------------------------------------------------------------------------
# Deterministic parameter init, packed into three contiguous slabs.
# ----------------------------------------------------------------------------
def init_params(key, D, max_len, spatial_dim, patch_size, dff=64):
    off32, rows32, n32 = _w32_layout(D, dff)
    keys = iter(jax.random.split(key, 24))

    def lin(din, dout, s=0.05):
        return s * jax.random.normal(next(keys), (din, dout), jnp.float32)

    raw = {}
    for n in ["enc_wq", "enc_wk", "enc_wv", "enc_wo", "task_w", "ff_w",
              "dsa_wq", "dsa_wk", "dsa_wv", "dsa_wo",
              "dca_wq", "dca_wk", "dca_wv", "dca_wo"]:
        raw[n] = lin(D, D)
    raw["enc_w2"] = lin(dff, D)
    raw["dec_w2"] = lin(dff, D)
    for n in ["enc_bq", "enc_bk", "enc_bv", "enc_bo", "enc_b2",
              "task_b", "ff_b",
              "dsa_bq", "dsa_bk", "dsa_bv", "dsa_bo",
              "dca_bq", "dca_bk", "dca_bv", "dca_bo",
              "dec_b2",
              "enc_ln1_b", "enc_ln2_b", "dec_ln1_b", "dec_ln2_b", "dec_ln3_b"]:
        raw[n] = jnp.zeros((1, D), jnp.float32)
    for n in ["enc_ln1_g", "enc_ln2_g", "dec_ln1_g", "dec_ln2_g", "dec_ln3_g"]:
        raw[n] = jnp.ones((1, D), jnp.float32)

    # width-32 slab: all (Din, D) weights + (1, D) bias/LN rows
    w32 = jnp.zeros((n32, D), jnp.float32)
    for name, o in off32.items():
        w32 = w32.at[o:o + rows32[name], :].set(raw[name])

    # width-dff slab: FFN-in weights + FFN-in biases
    n64 = ((2 * D + 2 + 7) // 8) * 8
    w64 = jnp.zeros((n64, dff), jnp.float32)
    w64 = w64.at[0:D, :].set(lin(D, dff))        # enc_w1
    w64 = w64.at[D:2 * D, :].set(lin(D, dff))    # dec_w1
    # rows 2D (enc_b1) and 2D+1 (dec_b1) stay zero

    # fused-heads slab, 128-lane padded: rows 0:D weight, row D bias
    nh = ((D + 1 + 7) // 8) * 8
    head = jnp.zeros((nh, 128), jnp.float32)
    head = head.at[0:D, 0:8].set(lin(D, 8))      # [token(2)|y,x,t mu|y,x,t logvar]

    querypos = 0.05 * jax.random.normal(next(keys), (max_len, D), jnp.float32)

    H, W = spatial_dim
    patchpos = sine_pos_embed_2d(H, W, D).reshape(H * W, D)           # (S, D)
    queryfix = sine_pos_embed_2d(H * patch_size, W * patch_size, D)   # (Hpx, Wpx, D)

    return {"w32": w32, "w64": w64, "head": head,
            "querypos": querypos, "patchpos": patchpos, "queryfix": queryfix}


# ----------------------------------------------------------------------------
# Forward
# ----------------------------------------------------------------------------
def gazeformer_forward(params, src, tgt, task, eps_key, max_len=7):
    p = params
    S, N, D = src.shape
    L = max_len
    dff = p["w64"].shape[1]
    AUX_ROWS = 16                                   # >= 2 + L, sublane multiple

    src_nsd = jnp.transpose(src, (1, 0, 2))         # (N, S, D) batch-major

    # first-fixation sine embedding gather (data-dependent -> wrapper glue)
    first = p["queryfix"][tgt[:, 0], tgt[:, 1], :]  # (N, D)
    # reparameterization noise (randn_like). TODO(synk): could be drawn
    # in-kernel with pltpu.prng_*; kept as a tiny input for exact N(0,1) semantics.
    eps = jax.random.normal(eps_key, (N, L, 3), jnp.float32)

    # pack all per-batch non-weight inputs into one small slab
    aux = jnp.zeros((N, AUX_ROWS, D), jnp.float32)
    aux = aux.at[:, 0, :].set(first)
    aux = aux.at[:, 1, :].set(task)
    aux = aux.at[:, 2:2 + L, 0:3].set(eps)

    off32, _, n32 = _w32_layout(D, dff)
    kernel = functools.partial(_gazeformer_kernel,
                               S=S, L=L, D=D, dff=dff, off32=off32)

    out = pl.pallas_call(
        kernel,
        grid=(N,),
        in_specs=[
            pl.BlockSpec((None, S, D), lambda n: (n, 0, 0)),          # src
            pl.BlockSpec((None, AUX_ROWS, D), lambda n: (n, 0, 0)),   # aux
            pl.BlockSpec((S, D), lambda n: (0, 0)),                   # patchpos (shared)
            pl.BlockSpec((L, D), lambda n: (0, 0)),                   # querypos (shared)
            pl.BlockSpec((n32, D), lambda n: (0, 0)),                 # w32 slab
            pl.BlockSpec((p["w64"].shape[0], dff), lambda n: (0, 0)), # w64 slab
            pl.BlockSpec((p["head"].shape[0], 128), lambda n: (0, 0)),# head slab
        ],
        out_specs=pl.BlockSpec((None, L, 128), lambda n: (n, 0, 0)),
        out_shape=jax.ShapeDtypeStruct((N, L, 128), jnp.float32),
        compiler_params=pltpu.CompilerParams(
            dimension_semantics=("parallel",)),
        cost_estimate=_cost_estimate(N, S, L, D, dff, p),
    )(src_nsd, aux, p["patchpos"], p["querypos"], p["w32"], p["w64"], p["head"])

    token_log_probs = jnp.transpose(out[:, :, 0:2], (1, 0, 2))   # (L, N, 2)
    y = jnp.transpose(out[:, :, 2:3], (1, 0, 2))                 # (L, N, 1)
    x_out = jnp.transpose(out[:, :, 3:4], (1, 0, 2))
    t = jnp.transpose(out[:, :, 4:5], (1, 0, 2))
    return token_log_probs, y, x_out, t


# ----------------------------------------------------------------------------
if __name__ == "__main__":
    D = 32            # transformer.d_model
    N = 2             # batch
    MAX_LEN = 7
    SPATIAL = (2, 2)  # spatial_dim
    PATCH = 16
    S = SPATIAL[0] * SPATIAL[1]

    key = jax.random.PRNGKey(0)
    k_param, k_src, k_task, k_tgt_r, k_tgt_c, k_eps = jax.random.split(key, 6)

    params = init_params(k_param, D, MAX_LEN, SPATIAL, PATCH)
    src = jax.random.normal(k_src, (S, N, D), jnp.float32)       # (tokens, batch, d_model)
    task = jax.random.normal(k_task, (N, D), jnp.float32)        # task embedding per sample
    tgt = jnp.concatenate(                                        # first-fixation pixel coords
        [jax.random.randint(k_tgt_r, (N, 1), 0, SPATIAL[0] * PATCH),
         jax.random.randint(k_tgt_c, (N, 1), 0, SPATIAL[1] * PATCH)], axis=1)

    fwd = jax.jit(functools.partial(gazeformer_forward, max_len=MAX_LEN))
    token_log_probs, y, x_out, t = fwd(params, src, tgt, task, k_eps)
    jax.block_until_ready((token_log_probs, y, x_out, t))

    assert token_log_probs.shape == (MAX_LEN, N, 2)
    assert y.shape == (MAX_LEN, N, 1) and x_out.shape == (MAX_LEN, N, 1) and t.shape == (MAX_LEN, N, 1)
    assert bool(jnp.all(jnp.isfinite(token_log_probs)))
    assert bool(jnp.all(jnp.isfinite(y))) and bool(jnp.all(jnp.isfinite(x_out))) and bool(jnp.all(jnp.isfinite(t)))
    print("KERNEL_OK")
</pallas_src>

<mosaic_0001>
module attributes {stable_mosaic.version = 11 : i64} {
  func.func @_gazeformer_kernel(%arg0: i32, %arg1: memref<1x4x32xf32, #tpu.memory_space<vmem>>, %arg2: memref<1x16x32xf32, #tpu.memory_space<vmem>>, %arg3: memref<4x32xf32, #tpu.memory_space<vmem>>, %arg4: memref<7x32xf32, #tpu.memory_space<vmem>>, %arg5: memref<608x32xf32, #tpu.memory_space<vmem>>, %arg6: memref<72x64xf32, #tpu.memory_space<vmem>>, %arg7: memref<40x128xf32, #tpu.memory_space<vmem>>, %arg8: memref<1x7x128xf32, #tpu.memory_space<vmem>>) attributes {dimension_semantics = [#tpu.dimension_semantics<parallel>], iteration_bounds = array<i64: 2>, scalar_prefetch = 0 : i64, scratch_operands = 0 : i64, tpu.core_type = #tpu.core_type<tc>, window_params = [{transform_indices = @transform_0, window_bounds = array<i64: 1, 4, 32>}, {transform_indices = @transform_1, window_bounds = array<i64: 1, 16, 32>}, {pipeline_mode = #tpu.pipeline_mode<synchronous>, transform_indices = @transform_2, window_bounds = array<i64: 4, 32>}, {pipeline_mode = #tpu.pipeline_mode<synchronous>, transform_indices = @transform_3, window_bounds = array<i64: 7, 32>}, {pipeline_mode = #tpu.pipeline_mode<synchronous>, transform_indices = @transform_4, window_bounds = array<i64: 608, 32>}, {pipeline_mode = #tpu.pipeline_mode<synchronous>, transform_indices = @transform_5, window_bounds = array<i64: 72, 64>}, {pipeline_mode = #tpu.pipeline_mode<synchronous>, transform_indices = @transform_6, window_bounds = array<i64: 40, 128>}, {transform_indices = @transform_7, window_bounds = array<i64: 1, 7, 128>}]} {
    %c0 = arith.constant 0 : index
    %c0_0 = arith.constant 0 : index
    %c0_1 = arith.constant 0 : index
    %0 = vector.load %arg1[%c0, %c0_0, %c0_1] : memref<1x4x32xf32, #tpu.memory_space<vmem>>, vector<1x4x32xf32>
    %1 = vector.shape_cast %0 : vector<1x4x32xf32> to vector<4x32xf32>
    %c0_2 = arith.constant 0 : index
    %c0_3 = arith.constant 0 : index
    %2 = vector.load %arg3[%c0_2, %c0_3] : memref<4x32xf32, #tpu.memory_space<vmem>>, vector<4x32xf32>
    %c0_4 = arith.constant 0 : index
    %c0_5 = arith.constant 0 : index
    %3 = vector.load %arg4[%c0_4, %c0_5] : memref<7x32xf32, #tpu.memory_space<vmem>>, vector<7x32xf32>
    %c0_6 = arith.constant 0 : index
    %c0_7 = arith.constant 0 : index
    %c0_8 = arith.constant 0 : index
    %4 = vector.load %arg2[%c0_6, %c0_7, %c0_8] : memref<1x16x32xf32, #tpu.memory_space<vmem>>, vector<1x16x32xf32>
    %5 = vector.shape_cast %4 : vector<1x16x32xf32> to vector<16x32xf32>
    %6 = vector.extract_strided_slice %5 {offsets = [0, 0], sizes = [1, 32], strides = [1, 1]} : vector<16x32xf32> to vector<1x32xf32>
    %7 = vector.extract_strided_slice %5 {offsets = [1, 0], sizes = [1, 32], strides = [1, 1]} : vector<16x32xf32> to vector<1x32xf32>
    %8 = vector.extract_strided_slice %5 {offsets = [2, 0], sizes = [7, 3], strides = [1, 1]} : vector<16x32xf32> to vector<7x3xf32>
    %9 = arith.addf %1, %2 : vector<4x32xf32>
    %c0_9 = arith.constant 0 : index
    %c0_10 = arith.constant 0 : index
    %10 = vector.load %arg5[%c0_9, %c0_10] : memref<608x32xf32, #tpu.memory_space<vmem>>, vector<32x32xf32>
    %cst = arith.constant dense<0.000000e+00> : vector<4x32xf32>
    %11 = tpu.matmul %9, %10, %cst {dimension_numbers = #tpu.dot_dimension_numbers<[1], [0], [0], [1], [0, 0, 1, 1], [], []>} : vector<4x32xf32>, vector<32x32xf32>, vector<4x32xf32> -> vector<4x32xf32>
    %c576 = arith.constant 576 : index
    %c0_11 = arith.constant 0 : index
    %12 = vector.load %arg5[%c576, %c0_11] : memref<608x32xf32, #tpu.memory_space<vmem>>, vector<1x32xf32>
    %13 = vector.broadcast %12 : vector<1x32xf32> to vector<4x32xf32>
    %14 = arith.addf %11, %13 : vector<4x32xf32>
    %c32 = arith.constant 32 : index
    %c0_12 = arith.constant 0 : index
    %15 = vector.load %arg5[%c32, %c0_12] : memref<608x32xf32, #tpu.memory_space<vmem>>, vector<32x32xf32>
    %cst_13 = arith.constant dense<0.000000e+00> : vector<4x32xf32>
    %16 = tpu.matmul %9, %15, %cst_13 {dimension_numbers = #tpu.dot_dimension_numbers<[1], [0], [0], [1], [0, 0, 1, 1], [], []>} : vector<4x32xf32>, vector<32x32xf32>, vector<4x32xf32> -> vector<4x32xf32>
    %c577 = arith.constant 577 : index
    %c0_14 = arith.constant 0 : index
    %17 = vector.load %arg5[%c577, %c0_14] : memref<608x32xf32, #tpu.memory_space<vmem>>, vector<1x32xf32>
    %18 = vector.broadcast %17 : vector<1x32xf32> to vector<4x32xf32>
    %19 = arith.addf %16, %18 : vector<4x32xf32>
    %c64 = arith.constant 64 : index
    %c0_15 = arith.constant 0 : index
    %20 = vector.load %arg5[%c64, %c0_15] : memref<608x32xf32, #tpu.memory_space<vmem>>, vector<32x32xf32>
    %cst_16 = arith.constant dense<0.000000e+00> : vector<4x32xf32>
    %21 = tpu.matmul %1, %20, %cst_16 {dimension_numbers = #tpu.dot_dimension_numbers<[1], [0], [0], [1], [0, 0, 1, 1], [], []>} : vector<4x32xf32>, vector<32x32xf32>, vector<4x32xf32> -> vector<4x32xf32>
    %c578 = arith.constant 578 : index
    %c0_17 = arith.constant 0 : index
    %22 = vector.load %arg5[%c578, %c0_17] : memref<608x32xf32, #tpu.memory_space<vmem>>, vector<1x32xf32>
    %23 = vector.broadcast %22 : vector<1x32xf32> to vector<4x32xf32>
    %24 = arith.addf %21, %23 : vector<4x32xf32>
    "tpu.trace_start"() <{level = 10 : i32, message = "qd,kd->qk"}> : () -> ()
    %cst_18 = arith.constant dense<0.000000e+00> : vector<4x4xf32>
    %25 = tpu.matmul %14, %19, %cst_18 {dimension_numbers = #tpu.dot_dimension_numbers<[1], [1], [0], [0], [0, 0, 1, 0], [], []>} : vector<4x32xf32>, vector<4x32xf32>, vector<4x4xf32> -> vector<4x4xf32>
    "tpu.trace_stop"() : () -> ()
    %cst_19 = arith.constant 0.176776692 : f32
    %26 = vector.broadcast %cst_19 : f32 to vector<4x4xf32>
    %27 = arith.mulf %25, %26 : vector<4x4xf32>
    %cst_20 = arith.constant dense<0xFF800000> : vector<4xf32>
    %28 = vector.multi_reduction <maximumf>, %27, %cst_20 [1] : vector<4x4xf32> to vector<4xf32>
    %29 = vector.shape_cast %28 : vector<4xf32> to vector<4x1xf32>
    %30 = vector.broadcast %29 : vector<4x1xf32> to vector<4x4xf32>
    %31 = arith.subf %27, %30 : vector<4x4xf32>
    %32 = math.exp %31 : vector<4x4xf32>
    %cst_21 = arith.constant dense<0.000000e+00> : vector<4xf32>
    %33 = vector.multi_reduction <add>, %32, %cst_21 [1] : vector<4x4xf32> to vector<4xf32>
    %34 = vector.shape_cast %33 : vector<4xf32> to vector<4x1xf32>
    %35 = tpu.reciprocal %34 {approx = true} : vector<4x1xf32> -> vector<4x1xf32>
    %36 = vector.broadcast %35 : vector<4x1xf32> to vector<4x4xf32>
    %37 = arith.mulf %32, %36 : vector<4x4xf32>
    %cst_22 = arith.constant dense<0.000000e+00> : vector<4x32xf32>
    %38 = tpu.matmul %37, %24, %cst_22 {dimension_numbers = #tpu.dot_dimension_numbers<[1], [0], [0], [1], [0, 0, 1, 1], [], []>} : vector<4x4xf32>, vector<4x32xf32>, vector<4x32xf32> -> vector<4x32xf32>
    %c96 = arith.constant 96 : index
    %c0_23 = arith.constant 0 : index
    %39 = vector.load %arg5[%c96, %c0_23] : memref<608x32xf32, #tpu.memory_space<vmem>>, vector<32x32xf32>
    %cst_24 = arith.constant dense<0.000000e+00> : vector<4x32xf32>
    %40 = tpu.matmul %38, %39, %cst_24 {dimension_numbers = #tpu.dot_dimension_numbers<[1], [0], [0], [1], [0, 0, 1, 1], [], []>} : vector<4x32xf32>, vector<32x32xf32>, vector<4x32xf32> -> vector<4x32xf32>
    %c579 = arith.constant 579 : index
    %c0_25 = arith.constant 0 : index
    %41 = vector.load %arg5[%c579, %c0_25] : memref<608x32xf32, #tpu.memory_space<vmem>>, vector<1x32xf32>
    %42 = vector.broadcast %41 : vector<1x32xf32> to vector<4x32xf32>
    %43 = arith.addf %40, %42 : vector<4x32xf32>
    %44 = arith.addf %1, %43 : vector<4x32xf32>
    %cst_26 = arith.constant dense<0.000000e+00> : vector<4xf32>
    %45 = vector.multi_reduction <add>, %44, %cst_26 [1] : vector<4x32xf32> to vector<4xf32>
    %46 = vector.shape_cast %45 : vector<4xf32> to vector<4x1xf32>
    %cst_27 = arith.constant 3.200000e+01 : f32
    %47 = vector.broadcast %cst_27 : f32 to vector<4x1xf32>
    %48 = arith.divf %46, %47 : vector<4x1xf32>
    %49 = vector.broadcast %48 : vector<4x1xf32> to vector<4x32xf32>
    %50 = arith.subf %44, %49 : vector<4x32xf32>
    %51 = arith.mulf %50, %50 : vector<4x32xf32>
    %cst_28 = arith.constant dense<0.000000e+00> : vector<4xf32>
    %52 = vector.multi_reduction <add>, %51, %cst_28 [1] : vector<4x32xf32> to vector<4xf32>
    %53 = vector.shape_cast %52 : vector<4xf32> to vector<4x1xf32>
    %cst_29 = arith.constant 3.200000e+01 : f32
    %54 = vector.broadcast %cst_29 : f32 to vector<4x1xf32>
    %55 = arith.divf %53, %54 : vector<4x1xf32>
    %56 = vector.broadcast %48 : vector<4x1xf32> to vector<4x32xf32>
    %57 = arith.subf %44, %56 : vector<4x32xf32>
    %cst_30 = arith.constant 9.99999974E-6 : f32
    %58 = vector.broadcast %cst_30 : f32 to vector<4x1xf32>
    %59 = arith.addf %55, %58 : vector<4x1xf32>
    %60 = math.rsqrt %59 : vector<4x1xf32>
    %61 = vector.broadcast %60 : vector<4x1xf32> to vector<4x32xf32>
    %62 = arith.mulf %57, %61 : vector<4x32xf32>
    %c581 = arith.constant 581 : index
    %c0_31 = arith.constant 0 : index
    %63 = vector.load %arg5[%c581, %c0_31] : memref<608x32xf32, #tpu.memory_space<vmem>>, vector<1x32xf32>
    %64 = vector.broadcast %63 : vector<1x32xf32> to vector<4x32xf32>
    %65 = arith.mulf %62, %64 : vector<4x32xf32>
    %c582 = arith.constant 582 : index
    %c0_32 = arith.constant 0 : index
    %66 = vector.load %arg5[%c582, %c0_32] : memref<608x32xf32, #tpu.memory_space<vmem>>, vector<1x32xf32>
    %67 = vector.broadcast %66 : vector<1x32xf32> to vector<4x32xf32>
    %68 = arith.addf %65, %67 : vector<4x32xf32>
    %c0_33 = arith.constant 0 : index
    %c0_34 = arith.constant 0 : index
    %69 = vector.load %arg6[%c0_33, %c0_34] : memref<72x64xf32, #tpu.memory_space<vmem>>, vector<32x64xf32>
    %cst_35 = arith.constant dense<0.000000e+00> : vector<4x64xf32>
    %70 = tpu.matmul %68, %69, %cst_35 {dimension_numbers = #tpu.dot_dimension_numbers<[1], [0], [0], [1], [0, 0, 1, 1], [], []>} : vector<4x32xf32>, vector<32x64xf32>, vector<4x64xf32> -> vector<4x64xf32>
    %c64_36 = arith.constant 64 : index
    %c0_37 = arith.constant 0 : index
    %71 = vector.load %arg6[%c64_36, %c0_37] : memref<72x64xf32, #tpu.memory_space<vmem>>, vector<1x64xf32>
    %72 = vector.broadcast %71 : vector<1x64xf32> to vector<4x64xf32>
    %73 = arith.addf %70, %72 : vector<4x64xf32>
    %cst_38 = arith.constant 0.000000e+00 : f32
    %74 = vector.broadcast %cst_38 : f32 to vector<4x64xf32>
    %75 = arith.maximumf %73, %74 : vector<4x64xf32>
    %c128 = arith.constant 128 : index
    %c0_39 = arith.constant 0 : index
    %76 = vector.load %arg5[%c128, %c0_39] : memref<608x32xf32, #tpu.memory_space<vmem>>, vector<64x32xf32>
    %cst_40 = arith.constant dense<0.000000e+00> : vector<4x32xf32>
    %77 = tpu.matmul %75, %76, %cst_40 {dimension_numbers = #tpu.dot_dimension_numbers<[1], [0], [0], [1], [0, 0, 1, 1], [], []>} : vector<4x64xf32>, vector<64x32xf32>, vector<4x32xf32> -> vector<4x32xf32>
    %c580 = arith.constant 580 : index
    %c0_41 = arith.constant 0 : index
    %78 = vector.load %arg5[%c580, %c0_41] : memref<608x32xf32, #tpu.memory_space<vmem>>, vector<1x32xf32>
    %79 = vector.broadcast %78 : vector<1x32xf32> to vector<4x32xf32>
    %80 = arith.addf %77, %79 : vector<4x32xf32>
    %81 = arith.addf %68, %80 : vector<4x32xf32>
    %cst_42 = arith.constant dense<0.000000e+00> : vector<4xf32>
    %82 = vector.multi_reduction <add>, %81, %cst_42 [1] : vector<4x32xf32> to vector<4xf32>
    %83 = vector.shape_cast %82 : vector<4xf32> to vector<4x1xf32>
    %cst_43 = arith.constant 3.200000e+01 : f32
    %84 = vector.broadcast %cst_43 : f32 to vector<4x1xf32>
    %85 = arith.divf %83, %84 : vector<4x1xf32>
    %86 = vector.broadcast %85 : vector<4x1xf32> to vector<4x32xf32>
    %87 = arith.subf %81, %86 : vector<4x32xf32>
    %88 = arith.mulf %87, %87 : vector<4x32xf32>
    %cst_44 = arith.constant dense<0.000000e+00> : vector<4xf32>
    %89 = vector.multi_reduction <add>, %88, %cst_44 [1] : vector<4x32xf32> to vector<4xf32>
    %90 = vector.shape_cast %89 : vector<4xf32> to vector<4x1xf32>
    %cst_45 = arith.constant 3.200000e+01 : f32
    %91 = vector.broadcast %cst_45 : f32 to vector<4x1xf32>
    %92 = arith.divf %90, %91 : vector<4x1xf32>
    %93 = vector.broadcast %85 : vector<4x1xf32> to vector<4x32xf32>
    %94 = arith.subf %81, %93 : vector<4x32xf32>
    %cst_46 = arith.constant 9.99999974E-6 : f32
    %95 = vector.broadcast %cst_46 : f32 to vector<4x1xf32>
    %96 = arith.addf %92, %95 : vector<4x1xf32>
    %97 = math.rsqrt %96 : vector<4x1xf32>
    %98 = vector.broadcast %97 : vector<4x1xf32> to vector<4x32xf32>
    %99 = arith.mulf %94, %98 : vector<4x32xf32>
    %c583 = arith.constant 583 : index
    %c0_47 = arith.constant 0 : index
    %100 = vector.load %arg5[%c583, %c0_47] : memref<608x32xf32, #tpu.memory_space<vmem>>, vector<1x32xf32>
    %101 = vector.broadcast %100 : vector<1x32xf32> to vector<4x32xf32>
    %102 = arith.mulf %99, %101 : vector<4x32xf32>
    %c584 = arith.constant 584 : index
    %c0_48 = arith.constant 0 : index
    %103 = vector.load %arg5[%c584, %c0_48] : memref<608x32xf32, #tpu.memory_space<vmem>>, vector<1x32xf32>
    %104 = vector.broadcast %103 : vector<1x32xf32> to vector<4x32xf32>
    %105 = arith.addf %102, %104 : vector<4x32xf32>
    %c192 = arith.constant 192 : index
    %c0_49 = arith.constant 0 : index
    %106 = vector.load %arg5[%c192, %c0_49] : memref<608x32xf32, #tpu.memory_space<vmem>>, vector<32x32xf32>
    %cst_50 = arith.constant dense<0.000000e+00> : vector<1x32xf32>
    %107 = tpu.matmul %7, %106, %cst_50 {dimension_numbers = #tpu.dot_dimension_numbers<[1], [0], [0], [1], [0, 0, 1, 1], [], []>} : vector<1x32xf32>, vector<32x32xf32>, vector<1x32xf32> -> vector<1x32xf32>
    %c585 = arith.constant 585 : index
    %c0_51 = arith.constant 0 : index
    %108 = vector.load %arg5[%c585, %c0_51] : memref<608x32xf32, #tpu.memory_space<vmem>>, vector<1x32xf32>
    %109 = arith.addf %107, %108 : vector<1x32xf32>
    %110 = vector.broadcast %109 : vector<1x32xf32> to vector<4x32xf32>
    %111 = arith.addf %105, %110 : vector<4x32xf32>
    %c224 = arith.constant 224 : index
    %c0_52 = arith.constant 0 : index
    %112 = vector.load %arg5[%c224, %c0_52] : memref<608x32xf32, #tpu.memory_space<vmem>>, vector<32x32xf32>
    %cst_53 = arith.constant dense<0.000000e+00> : vector<1x32xf32>
    %113 = tpu.matmul %6, %112, %cst_53 {dimension_numbers = #tpu.dot_dimension_numbers<[1], [0], [0], [1], [0, 0, 1, 1], [], []>} : vector<1x32xf32>, vector<32x32xf32>, vector<1x32xf32> -> vector<1x32xf32>
    %c586 = arith.constant 586 : index
    %c0_54 = arith.constant 0 : index
    %114 = vector.load %arg5[%c586, %c0_54] : memref<608x32xf32, #tpu.memory_space<vmem>>, vector<1x32xf32>
    %115 = arith.addf %113, %114 : vector<1x32xf32>
    %116 = tpu.iota {dimensions = array<i32: 0>} : vector<7x32xi32>
    %c0_i32 = arith.constant 0 : i32
    %117 = vector.broadcast %c0_i32 : i32 to vector<7x32xi32>
    %118 = arith.cmpi eq, %116, %117 : vector<7x32xi32>
    %119 = vector.shape_cast %115 : vector<1x32xf32> to vector<1x32xf32>
    %120 = vector.broadcast %119 : vector<1x32xf32> to vector<7x32xf32>
    %cst_55 = arith.constant 0.000000e+00 : f32
    %121 = vector.broadcast %cst_55 : f32 to vector<7x32xf32>
    %122 = arith.select %118, %120, %121 : vector<7x32xi1>, vector<7x32xf32>
    %123 = arith.addf %122, %3 : vector<7x32xf32>
    %c256 = arith.constant 256 : index
    %c0_56 = arith.constant 0 : index
    %124 = vector.load %arg5[%c256, %c0_56] : memref<608x32xf32, #tpu.memory_space<vmem>>, vector<32x32xf32>
    %cst_57 = arith.constant dense<0.000000e+00> : vector<7x32xf32>
    %125 = tpu.matmul %123, %124, %cst_57 {dimension_numbers = #tpu.dot_dimension_numbers<[1], [0], [0], [1], [0, 0, 1, 1], [], []>} : vector<7x32xf32>, vector<32x32xf32>, vector<7x32xf32> -> vector<7x32xf32>
    %c587 = arith.constant 587 : index
    %c0_58 = arith.constant 0 : index
    %126 = vector.load %arg5[%c587, %c0_58] : memref<608x32xf32, #tpu.memory_space<vmem>>, vector<1x32xf32>
    %127 = vector.broadcast %126 : vector<1x32xf32> to vector<7x32xf32>
    %128 = arith.addf %125, %127 : vector<7x32xf32>
    %c288 = arith.constant 288 : index
    %c0_59 = arith.constant 0 : index
    %129 = vector.load %arg5[%c288, %c0_59] : memref<608x32xf32, #tpu.memory_space<vmem>>, vector<32x32xf32>
    %cst_60 = arith.constant dense<0.000000e+00> : vector<7x32xf32>
    %130 = tpu.matmul %123, %129, %cst_60 {dimension_numbers = #tpu.dot_dimension_numbers<[1], [0], [0], [1], [0, 0, 1, 1], [], []>} : vector<7x32xf32>, vector<32x32xf32>, vector<7x32xf32> -> vector<7x32xf32>
    %c588 = arith.constant 588 : index
    %c0_61 = arith.constant 0 : index
    %131 = vector.load %arg5[%c588, %c0_61] : memref<608x32xf32, #tpu.memory_space<vmem>>, vector<1x32xf32>
    %132 = vector.broadcast %131 : vector<1x32xf32> to vector<7x32xf32>
    %133 = arith.addf %130, %132 : vector<7x32xf32>
    %c320 = arith.constant 320 : index
    %c0_62 = arith.constant 0 : index
    %134 = vector.load %arg5[%c320, %c0_62] : memref<608x32xf32, #tpu.memory_space<vmem>>, vector<32x32xf32>
    %cst_63 = arith.constant dense<0.000000e+00> : vector<7x32xf32>
    %135 = tpu.matmul %122, %134, %cst_63 {dimension_numbers = #tpu.dot_dimension_numbers<[1], [0], [0], [1], [0, 0, 1, 1], [], []>} : vector<7x32xf32>, vector<32x32xf32>, vector<7x32xf32> -> vector<7x32xf32>
    %c589 = arith.constant 589 : index
    %c0_64 = arith.constant 0 : index
    %136 = vector.load %arg5[%c589, %c0_64] : memref<608x32xf32, #tpu.memory_space<vmem>>, vector<1x32xf32>
    %137 = vector.broadcast %136 : vector<1x32xf32> to vector<7x32xf32>
    %138 = arith.addf %135, %137 : vector<7x32xf32>
    "tpu.trace_start"() <{level = 10 : i32, message = "qd,kd->qk"}> : () -> ()
    %cst_65 = arith.constant dense<0.000000e+00> : vector<7x7xf32>
    %139 = tpu.matmul %128, %133, %cst_65 {dimension_numbers = #tpu.dot_dimension_numbers<[1], [1], [0], [0], [0, 0, 1, 0], [], []>} : vector<7x32xf32>, vector<7x32xf32>, vector<7x7xf32> -> vector<7x7xf32>
    "tpu.trace_stop"() : () -> ()
    %cst_66 = arith.constant 0.176776692 : f32
    %140 = vector.broadcast %cst_66 : f32 to vector<7x7xf32>
    %141 = arith.mulf %139, %140 : vector<7x7xf32>
    %cst_67 = arith.constant dense<0xFF800000> : vector<7xf32>
    %142 = vector.multi_reduction <maximumf>, %141, %cst_67 [1] : vector<7x7xf32> to vector<7xf32>
    %143 = vector.shape_cast %142 : vector<7xf32> to vector<7x1xf32>
    %144 = vector.broadcast %143 : vector<7x1xf32> to vector<7x7xf32>
    %145 = arith.subf %141, %144 : vector<7x7xf32>
    %146 = math.exp %145 : vector<7x7xf32>
    %cst_68 = arith.constant dense<0.000000e+00> : vector<7xf32>
    %147 = vector.multi_reduction <add>, %146, %cst_68 [1] : vector<7x7xf32> to vector<7xf32>
    %148 = vector.shape_cast %147 : vector<7xf32> to vector<7x1xf32>
    %149 = tpu.reciprocal %148 {approx = true} : vector<7x1xf32> -> vector<7x1xf32>
    %150 = vector.broadcast %149 : vector<7x1xf32> to vector<7x7xf32>
    %151 = arith.mulf %146, %150 : vector<7x7xf32>
    %cst_69 = arith.constant dense<0.000000e+00> : vector<7x32xf32>
    %152 = tpu.matmul %151, %138, %cst_69 {dimension_numbers = #tpu.dot_dimension_numbers<[1], [0], [0], [1], [0, 0, 1, 1], [], []>} : vector<7x7xf32>, vector<7x32xf32>, vector<7x32xf32> -> vector<7x32xf32>
    %c352 = arith.constant 352 : index
    %c0_70 = arith.constant 0 : index
    %153 = vector.load %arg5[%c352, %c0_70] : memref<608x32xf32, #tpu.memory_space<vmem>>, vector<32x32xf32>
    %cst_71 = arith.constant dense<0.000000e+00> : vector<7x32xf32>
    %154 = tpu.matmul %152, %153, %cst_71 {dimension_numbers = #tpu.dot_dimension_numbers<[1], [0], [0], [1], [0, 0, 1, 1], [], []>} : vector<7x32xf32>, vector<32x32xf32>, vector<7x32xf32> -> vector<7x32xf32>
    %c590 = arith.constant 590 : index
    %c0_72 = arith.constant 0 : index
    %155 = vector.load %arg5[%c590, %c0_72] : memref<608x32xf32, #tpu.memory_space<vmem>>, vector<1x32xf32>
    %156 = vector.broadcast %155 : vector<1x32xf32> to vector<7x32xf32>
    %157 = arith.addf %154, %156 : vector<7x32xf32>
    %158 = arith.addf %122, %157 : vector<7x32xf32>
    %cst_73 = arith.constant dense<0.000000e+00> : vector<7xf32>
    %159 = vector.multi_reduction <add>, %158, %cst_73 [1] : vector<7x32xf32> to vector<7xf32>
    %160 = vector.shape_cast %159 : vector<7xf32> to vector<7x1xf32>
    %cst_74 = arith.constant 3.200000e+01 : f32
    %161 = vector.broadcast %cst_74 : f32 to vector<7x1xf32>
    %162 = arith.divf %160, %161 : vector<7x1xf32>
    %163 = vector.broadcast %162 : vector<7x1xf32> to vector<7x32xf32>
    %164 = arith.subf %158, %163 : vector<7x32xf32>
    %165 = arith.mulf %164, %164 : vector<7x32xf32>
    %cst_75 = arith.constant dense<0.000000e+00> : vector<7xf32>
    %166 = vector.multi_reduction <add>, %165, %cst_75 [1] : vector<7x32xf32> to vector<7xf32>
    %167 = vector.shape_cast %166 : vector<7xf32> to vector<7x1xf32>
    %cst_76 = arith.constant 3.200000e+01 : f32
    %168 = vector.broadcast %cst_76 : f32 to vector<7x1xf32>
    %169 = arith.divf %167, %168 : vector<7x1xf32>
    %170 = vector.broadcast %162 : vector<7x1xf32> to vector<7x32xf32>
    %171 = arith.subf %158, %170 : vector<7x32xf32>
    %cst_77 = arith.constant 9.99999974E-6 : f32
    %172 = vector.broadcast %cst_77 : f32 to vector<7x1xf32>
    %173 = arith.addf %169, %172 : vector<7x1xf32>
    %174 = math.rsqrt %173 : vector<7x1xf32>
    %175 = vector.broadcast %174 : vector<7x1xf32> to vector<7x32xf32>
    %176 = arith.mulf %171, %175 : vector<7x32xf32>
    %c596 = arith.constant 596 : index
    %c0_78 = arith.constant 0 : index
    %177 = vector.load %arg5[%c596, %c0_78] : memref<608x32xf32, #tpu.memory_space<vmem>>, vector<1x32xf32>
    %178 = vector.broadcast %177 : vector<1x32xf32> to vector<7x32xf32>
    %179 = arith.mulf %176, %178 : vector<7x32xf32>
    %c597 = arith.constant 597 : index
    %c0_79 = arith.constant 0 : index
    %180 = vector.load %arg5[%c597, %c0_79] : memref<608x32xf32, #tpu.memory_space<vmem>>, vector<1x32xf32>
    %181 = vector.broadcast %180 : vector<1x32xf32> to vector<7x32xf32>
    %182 = arith.addf %179, %181 : vector<7x32xf32>
    %183 = arith.addf %182, %3 : vector<7x32xf32>
    %c384 = arith.constant 384 : index
    %c0_80 = arith.constant 0 : index
    %184 = vector.load %arg5[%c384, %c0_80] : memref<608x32xf32, #tpu.memory_space<vmem>>, vector<32x32xf32>
    %cst_81 = arith.constant dense<0.000000e+00> : vector<7x32xf32>
    %185 = tpu.matmul %183, %184, %cst_81 {dimension_numbers = #tpu.dot_dimension_numbers<[1], [0], [0], [1], [0, 0, 1, 1], [], []>} : vector<7x32xf32>, vector<32x32xf32>, vector<7x32xf32> -> vector<7x32xf32>
    %c591 = arith.constant 591 : index
    %c0_82 = arith.constant 0 : index
    %186 = vector.load %arg5[%c591, %c0_82] : memref<608x32xf32, #tpu.memory_space<vmem>>, vector<1x32xf32>
    %187 = vector.broadcast %186 : vector<1x32xf32> to vector<7x32xf32>
    %188 = arith.addf %185, %187 : vector<7x32xf32>
    %189 = arith.addf %111, %2 : vector<4x32xf32>
    %c416 = arith.constant 416 : index
    %c0_83 = arith.constant 0 : index
    %190 = vector.load %arg5[%c416, %c0_83] : memref<608x32xf32, #tpu.memory_space<vmem>>, vector<32x32xf32>
    %cst_84 = arith.constant dense<0.000000e+00> : vector<4x32xf32>
    %191 = tpu.matmul %189, %190, %cst_84 {dimension_numbers = #tpu.dot_dimension_numbers<[1], [0], [0], [1], [0, 0, 1, 1], [], []>} : vector<4x32xf32>, vector<32x32xf32>, vector<4x32xf32> -> vector<4x32xf32>
    %c592 = arith.constant 592 : index
    %c0_85 = arith.constant 0 : index
    %192 = vector.load %arg5[%c592, %c0_85] : memref<608x32xf32, #tpu.memory_space<vmem>>, vector<1x32xf32>
    %193 = vector.broadcast %192 : vector<1x32xf32> to vector<4x32xf32>
    %194 = arith.addf %191, %193 : vector<4x32xf32>
    %c448 = arith.constant 448 : index
    %c0_86 = arith.constant 0 : index
    %195 = vector.load %arg5[%c448, %c0_86] : memref<608x32xf32, #tpu.memory_space<vmem>>, vector<32x32xf32>
    %cst_87 = arith.constant dense<0.000000e+00> : vector<4x32xf32>
    %196 = tpu.matmul %111, %195, %cst_87 {dimension_numbers = #tpu.dot_dimension_numbers<[1], [0], [0], [1], [0, 0, 1, 1], [], []>} : vector<4x32xf32>, vector<32x32xf32>, vector<4x32xf32> -> vector<4x32xf32>
    %c593 = arith.constant 593 : index
    %c0_88 = arith.constant 0 : index
    %197 = vector.load %arg5[%c593, %c0_88] : memref<608x32xf32, #tpu.memory_space<vmem>>, vector<1x32xf32>
    %198 = vector.broadcast %197 : vector<1x32xf32> to vector<4x32xf32>
    %199 = arith.addf %196, %198 : vector<4x32xf32>
    "tpu.trace_start"() <{level = 10 : i32, message = "qd,kd->qk"}> : () -> ()
    %cst_89 = arith.constant dense<0.000000e+00> : vector<7x4xf32>
    %200 = tpu.matmul %188, %194, %cst_89 {dimension_numbers = #tpu.dot_dimension_numbers<[1], [1], [0], [0], [0, 0, 1, 0], [], []>} : vector<7x32xf32>, vector<4x32xf32>, vector<7x4xf32> -> vector<7x4xf32>
    "tpu.trace_stop"() : () -> ()
    %cst_90 = arith.constant 0.176776692 : f32
    %201 = vector.broadcast %cst_90 : f32 to vector<7x4xf32>
    %202 = arith.mulf %200, %201 : vector<7x4xf32>
    %cst_91 = arith.constant dense<0xFF800000> : vector<7xf32>
    %203 = vector.multi_reduction <maximumf>, %202, %cst_91 [1] : vector<7x4xf32> to vector<7xf32>
    %204 = vector.shape_cast %203 : vector<7xf32> to vector<7x1xf32>
    %205 = vector.broadcast %204 : vector<7x1xf32> to vector<7x4xf32>
    %206 = arith.subf %202, %205 : vector<7x4xf32>
    %207 = math.exp %206 : vector<7x4xf32>
    %cst_92 = arith.constant dense<0.000000e+00> : vector<7xf32>
    %208 = vector.multi_reduction <add>, %207, %cst_92 [1] : vector<7x4xf32> to vector<7xf32>
    %209 = vector.shape_cast %208 : vector<7xf32> to vector<7x1xf32>
    %210 = tpu.reciprocal %209 {approx = true} : vector<7x1xf32> -> vector<7x1xf32>
    %211 = vector.broadcast %210 : vector<7x1xf32> to vector<7x4xf32>
    %212 = arith.mulf %207, %211 : vector<7x4xf32>
    %cst_93 = arith.constant dense<0.000000e+00> : vector<7x32xf32>
    %213 = tpu.matmul %212, %199, %cst_93 {dimension_numbers = #tpu.dot_dimension_numbers<[1], [0], [0], [1], [0, 0, 1, 1], [], []>} : vector<7x4xf32>, vector<4x32xf32>, vector<7x32xf32> -> vector<7x32xf32>
    %c480 = arith.constant 480 : index
    %c0_94 = arith.constant 0 : index
    %214 = vector.load %arg5[%c480, %c0_94] : memref<608x32xf32, #tpu.memory_space<vmem>>, vector<32x32xf32>
    %cst_95 = arith.constant dense<0.000000e+00> : vector<7x32xf32>
    %215 = tpu.matmul %213, %214, %cst_95 {dimension_numbers = #tpu.dot_dimension_numbers<[1], [0], [0], [1], [0, 0, 1, 1], [], []>} : vector<7x32xf32>, vector<32x32xf32>, vector<7x32xf32> -> vector<7x32xf32>
    %c594 = arith.constant 594 : index
    %c0_96 = arith.constant 0 : index
    %216 = vector.load %arg5[%c594, %c0_96] : memref<608x32xf32, #tpu.memory_space<vmem>>, vector<1x32xf32>
    %217 = vector.broadcast %216 : vector<1x32xf32> to vector<7x32xf32>
    %218 = arith.addf %215, %217 : vector<7x32xf32>
    %219 = arith.addf %182, %218 : vector<7x32xf32>
    %cst_97 = arith.constant dense<0.000000e+00> : vector<7xf32>
    %220 = vector.multi_reduction <add>, %219, %cst_97 [1] : vector<7x32xf32> to vector<7xf32>
    %221 = vector.shape_cast %220 : vector<7xf32> to vector<7x1xf32>
    %cst_98 = arith.constant 3.200000e+01 : f32
    %222 = vector.broadcast %cst_98 : f32 to vector<7x1xf32>
    %223 = arith.divf %221, %222 : vector<7x1xf32>
    %224 = vector.broadcast %223 : vector<7x1xf32> to vector<7x32xf32>
    %225 = arith.subf %219, %224 : vector<7x32xf32>
    %226 = arith.mulf %225, %225 : vector<7x32xf32>
    %cst_99 = arith.constant dense<0.000000e+00> : vector<7xf32>
    %227 = vector.multi_reduction <add>, %226, %cst_99 [1] : vector<7x32xf32> to vector<7xf32>
    %228 = vector.shape_cast %227 : vector<7xf32> to vector<7x1xf32>
    %cst_100 = arith.constant 3.200000e+01 : f32
    %229 = vector.broadcast %cst_100 : f32 to vector<7x1xf32>
    %230 = arith.divf %228, %229 : vector<7x1xf32>
    %231 = vector.broadcast %223 : vector<7x1xf32> to vector<7x32xf32>
    %232 = arith.subf %219, %231 : vector<7x32xf32>
    %cst_101 = arith.constant 9.99999974E-6 : f32
    %233 = vector.broadcast %cst_101 : f32 to vector<7x1xf32>
    %234 = arith.addf %230, %233 : vector<7x1xf32>
    %235 = math.rsqrt %234 : vector<7x1xf32>
    %236 = vector.broadcast %235 : vector<7x1xf32> to vector<7x32xf32>
    %237 = arith.mulf %232, %236 : vector<7x32xf32>
    %c598 = arith.constant 598 : index
    %c0_102 = arith.constant 0 : index
    %238 = vector.load %arg5[%c598, %c0_102] : memref<608x32xf32, #tpu.memory_space<vmem>>, vector<1x32xf32>
    %239 = vector.broadcast %238 : vector<1x32xf32> to vector<7x32xf32>
    %240 = arith.mulf %237, %239 : vector<7x32xf32>
    %c599 = arith.constant 599 : index
    %c0_103 = arith.constant 0 : index
    %241 = vector.load %arg5[%c599, %c0_103] : memref<608x32xf32, #tpu.memory_space<vmem>>, vector<1x32xf32>
    %242 = vector.broadcast %241 : vector<1x32xf32> to vector<7x32xf32>
    %243 = arith.addf %240, %242 : vector<7x32xf32>
    %c32_104 = arith.constant 32 : index
    %c0_105 = arith.constant 0 : index
    %244 = vector.load %arg6[%c32_104, %c0_105] : memref<72x64xf32, #tpu.memory_space<vmem>>, vector<32x64xf32>
    %cst_106 = arith.constant dense<0.000000e+00> : vector<7x64xf32>
    %245 = tpu.matmul %243, %244, %cst_106 {dimension_numbers = #tpu.dot_dimension_numbers<[1], [0], [0], [1], [0, 0, 1, 1], [], []>} : vector<7x32xf32>, vector<32x64xf32>, vector<7x64xf32> -> vector<7x64xf32>
    %c65 = arith.constant 65 : index
    %c0_107 = arith.constant 0 : index
    %246 = vector.load %arg6[%c65, %c0_107] : memref<72x64xf32, #tpu.memory_space<vmem>>, vector<1x64xf32>
    %247 = vector.broadcast %246 : vector<1x64xf32> to vector<7x64xf32>
    %248 = arith.addf %245, %247 : vector<7x64xf32>
    %cst_108 = arith.constant 0.000000e+00 : f32
    %249 = vector.broadcast %cst_108 : f32 to vector<7x64xf32>
    %250 = arith.maximumf %248, %249 : vector<7x64xf32>
    %c512 = arith.constant 512 : index
    %c0_109 = arith.constant 0 : index
    %251 = vector.load %arg5[%c512, %c0_109] : memref<608x32xf32, #tpu.memory_space<vmem>>, vector<64x32xf32>
    %cst_110 = arith.constant dense<0.000000e+00> : vector<7x32xf32>
    %252 = tpu.matmul %250, %251, %cst_110 {dimension_numbers = #tpu.dot_dimension_numbers<[1], [0], [0], [1], [0, 0, 1, 1], [], []>} : vector<7x64xf32>, vector<64x32xf32>, vector<7x32xf32> -> vector<7x32xf32>
    %c595 = arith.constant 595 : index
    %c0_111 = arith.constant 0 : index
    %253 = vector.load %arg5[%c595, %c0_111] : memref<608x32xf32, #tpu.memory_space<vmem>>, vector<1x32xf32>
    %254 = vector.broadcast %253 : vector<1x32xf32> to vector<7x32xf32>
    %255 = arith.addf %252, %254 : vector<7x32xf32>
    %256 = arith.addf %243, %255 : vector<7x32xf32>
    %cst_112 = arith.constant dense<0.000000e+00> : vector<7xf32>
    %257 = vector.multi_reduction <add>, %256, %cst_112 [1] : vector<7x32xf32> to vector<7xf32>
    %258 = vector.shape_cast %257 : vector<7xf32> to vector<7x1xf32>
    %cst_113 = arith.constant 3.200000e+01 : f32
    %259 = vector.broadcast %cst_113 : f32 to vector<7x1xf32>
    %260 = arith.divf %258, %259 : vector<7x1xf32>
    %261 = vector.broadcast %260 : vector<7x1xf32> to vector<7x32xf32>
    %262 = arith.subf %256, %261 : vector<7x32xf32>
    %263 = arith.mulf %262, %262 : vector<7x32xf32>
    %cst_114 = arith.constant dense<0.000000e+00> : vector<7xf32>
    %264 = vector.multi_reduction <add>, %263, %cst_114 [1] : vector<7x32xf32> to vector<7xf32>
    %265 = vector.shape_cast %264 : vector<7xf32> to vector<7x1xf32>
    %cst_115 = arith.constant 3.200000e+01 : f32
    %266 = vector.broadcast %cst_115 : f32 to vector<7x1xf32>
    %267 = arith.divf %265, %266 : vector<7x1xf32>
    %268 = vector.broadcast %260 : vector<7x1xf32> to vector<7x32xf32>
    %269 = arith.subf %256, %268 : vector<7x32xf32>
    %cst_116 = arith.constant 9.99999974E-6 : f32
    %270 = vector.broadcast %cst_116 : f32 to vector<7x1xf32>
    %271 = arith.addf %267, %270 : vector<7x1xf32>
    %272 = math.rsqrt %271 : vector<7x1xf32>
    %273 = vector.broadcast %272 : vector<7x1xf32> to vector<7x32xf32>
    %274 = arith.mulf %269, %273 : vector<7x32xf32>
    %c600 = arith.constant 600 : index
    %c0_117 = arith.constant 0 : index
    %275 = vector.load %arg5[%c600, %c0_117] : memref<608x32xf32, #tpu.memory_space<vmem>>, vector<1x32xf32>
    %276 = vector.broadcast %275 : vector<1x32xf32> to vector<7x32xf32>
    %277 = arith.mulf %274, %276 : vector<7x32xf32>
    %c601 = arith.constant 601 : index
    %c0_118 = arith.constant 0 : index
    %278 = vector.load %arg5[%c601, %c0_118] : memref<608x32xf32, #tpu.memory_space<vmem>>, vector<1x32xf32>
    %279 = vector.broadcast %278 : vector<1x32xf32> to vector<7x32xf32>
    %280 = arith.addf %277, %279 : vector<7x32xf32>
    %c0_119 = arith.constant 0 : index
    %c0_120 = arith.constant 0 : index
    %281 = vector.load %arg7[%c0_119, %c0_120] : memref<40x128xf32, #tpu.memory_space<vmem>>, vector<32x128xf32>
    %cst_121 = arith.constant dense<0.000000e+00> : vector<7x128xf32>
    %282 = tpu.matmul %280, %281, %cst_121 {dimension_numbers = #tpu.dot_dimension_numbers<[1], [0], [0], [1], [0, 0, 1, 1], [], []>} : vector<7x32xf32>, vector<32x128xf32>, vector<7x128xf32> -> vector<7x128xf32>
    %c32_122 = arith.constant 32 : index
    %c0_123 = arith.constant 0 : index
    %283 = vector.load %arg7[%c32_122, %c0_123] : memref<40x128xf32, #tpu.memory_space<vmem>>, vector<1x128xf32>
    %284 = vector.broadcast %283 : vector<1x128xf32> to vector<7x128xf32>
    %285 = arith.addf %282, %284 : vector<7x128xf32>
    %286 = vector.extract_strided_slice %285 {offsets = [0, 0], sizes = [7, 2], strides = [1, 1]} : vector<7x128xf32> to vector<7x2xf32>
    %287 = vector.extract_strided_slice %285 {offsets = [0, 2], sizes = [7, 3], strides = [1, 1]} : vector<7x128xf32> to vector<7x3xf32>
    %288 = vector.extract_strided_slice %285 {offsets = [0, 5], sizes = [7, 3], strides = [1, 1]} : vector<7x128xf32> to vector<7x3xf32>
    %cst_124 = arith.constant dense<0xFF800000> : vector<7xf32>
    %289 = vector.multi_reduction <maximumf>, %286, %cst_124 [1] : vector<7x2xf32> to vector<7xf32>
    %290 = vector.shape_cast %289 : vector<7xf32> to vector<7x1xf32>
    %291 = vector.broadcast %290 : vector<7x1xf32> to vector<7x2xf32>
    %292 = arith.subf %286, %291 : vector<7x2xf32>
    %293 = math.exp %292 : vector<7x2xf32>
    %cst_125 = arith.constant dense<0.000000e+00> : vector<7xf32>
    %294 = vector.multi_reduction <add>, %293, %cst_125 [1] : vector<7x2xf32> to vector<7xf32>
    %295 = vector.shape_cast %294 : vector<7xf32> to vector<7x1xf32>
    %296 = math.log %295 : vector<7x1xf32>
    %297 = vector.broadcast %296 : vector<7x1xf32> to vector<7x2xf32>
    %298 = arith.subf %292, %297 : vector<7x2xf32>
    %cst_126 = arith.constant 5.000000e-01 : f32
    %299 = vector.broadcast %cst_126 : f32 to vector<7x3xf32>
    %300 = arith.mulf %299, %288 : vector<7x3xf32>
    %301 = math.exp %300 : vector<7x3xf32>
    %302 = arith.mulf %8, %301 : vector<7x3xf32>
    %303 = arith.addf %287, %302 : vector<7x3xf32>
    %cst_127 = arith.constant 0.000000e+00 : f32
    %304 = vector.broadcast %cst_127 : f32 to vector<7x3xf32>
    %305 = arith.maximumf %303, %304 : vector<7x3xf32>
    %cst_128 = arith.constant 0.000000e+00 : f32
    %306 = vector.broadcast %cst_128 : f32 to vector<7x128xf32>
    %c0_129 = arith.constant 0 : index
    %c0_130 = arith.constant 0 : index
    %c0_131 = arith.constant 0 : index
    %307 = vector.load %arg8[%c0_129, %c0_130, %c0_131] : memref<1x7x128xf32, #tpu.memory_space<vmem>>, vector<1x7x128xf32>
    %308 = vector.shape_cast %307 : vector<1x7x128xf32> to vector<7x128xf32>
    %309 = vector.shape_cast %306 : vector<7x128xf32> to vector<1x7x128xf32>
    tpu.vector_store %arg8[%c0_129, %c0_130, %c0_131], %309 {strides = array<i32>} : memref<1x7x128xf32, #tpu.memory_space<vmem>>, vector<1x7x128xf32>,
    %c0_132 = arith.constant 0 : index
    %c0_133 = arith.constant 0 : index
    %c0_134 = arith.constant 0 : index
    %310 = vector.load %arg8[%c0_132, %c0_133, %c0_134] : memref<1x7x128xf32, #tpu.memory_space<vmem>>, vector<1x7x2xf32>
    %311 = vector.shape_cast %310 : vector<1x7x2xf32> to vector<7x2xf32>
    %312 = vector.shape_cast %298 : vector<7x2xf32> to vector<1x7x2xf32>
    tpu.vector_store %arg8[%c0_132, %c0_133, %c0_134], %312 {strides = array<i32>} : memref<1x7x128xf32, #tpu.memory_space<vmem>>, vector<1x7x2xf32>,
    %c0_135 = arith.constant 0 : index
    %c0_136 = arith.constant 0 : index
    %c2 = arith.constant 2 : index
    %313 = vector.load %arg8[%c0_135, %c0_136, %c2] : memref<1x7x128xf32, #tpu.memory_space<vmem>>, vector<1x7x3xf32>
    %314 = vector.shape_cast %313 : vector<1x7x3xf32> to vector<7x3xf32>
    %315 = vector.shape_cast %305 : vector<7x3xf32> to vector<1x7x3xf32>
    tpu.vector_store %arg8[%c0_135, %c0_136, %c2], %315 {strides = array<i32>} : memref<1x7x128xf32, #tpu.memory_space<vmem>>, vector<1x7x3xf32>,
    return
  }
  func.func @transform_0(%arg0: i32) -> (i32, i32, i32) {
    %c0_i32 = arith.constant 0 : i32
    %c0_i32_0 = arith.constant 0 : i32
    %c0_i32_1 = arith.constant 0 : i32
    return %arg0, %c0_i32, %c0_i32_0 : i32, i32, i32
  }
  func.func @transform_1(%arg0: i32) -> (i32, i32, i32) {
    %c0_i32 = arith.constant 0 : i32
    %c0_i32_0 = arith.constant 0 : i32
    %c0_i32_1 = arith.constant 0 : i32
    return %arg0, %c0_i32, %c0_i32_0 : i32, i32, i32
  }
  func.func @transform_2(%arg0: i32) -> (i32, i32) {
    %c0_i32 = arith.constant 0 : i32
    %c0_i32_0 = arith.constant 0 : i32
    %c0_i32_1 = arith.constant 0 : i32
    return %c0_i32, %c0_i32_0 : i32, i32
  }
  func.func @transform_3(%arg0: i32) -> (i32, i32) {
    %c0_i32 = arith.constant 0 : i32
    %c0_i32_0 = arith.constant 0 : i32
    %c0_i32_1 = arith.constant 0 : i32
    return %c0_i32, %c0_i32_0 : i32, i32
  }
  func.func @transform_4(%arg0: i32) -> (i32, i32) {
    %c0_i32 = arith.constant 0 : i32
    %c0_i32_0 = arith.constant 0 : i32
    %c0_i32_1 = arith.constant 0 : i32
    return %c0_i32, %c0_i32_0 : i32, i32
  }
  func.func @transform_5(%arg0: i32) -> (i32, i32) {
    %c0_i32 = arith.constant 0 : i32
    %c0_i32_0 = arith.constant 0 : i32
    %c0_i32_1 = arith.constant 0 : i32
    return %c0_i32, %c0_i32_0 : i32, i32
  }
  func.func @transform_6(%arg0: i32) -> (i32, i32) {
    %c0_i32 = arith.constant 0 : i32
    %c0_i32_0 = arith.constant 0 : i32
    %c0_i32_1 = arith.constant 0 : i32
    return %c0_i32, %c0_i32_0 : i32, i32
  }
  func.func @transform_7(%arg0: i32) -> (i32, i32, i32) {
    %c0_i32 = arith.constant 0 : i32
    %c0_i32_0 = arith.constant 0 : i32
    %c0_i32_1 = arith.constant 0 : i32
    return %arg0, %c0_i32, %c0_i32_0 : i32, i32, i32
  }
}

</mosaic_0001>

<bundles_post_ra>
// kernel: gazeformer_forward.1
= control target key start
LH: loop header
LB: loop body
LE: loop exit
PB: predicated region body
PF: predicated region fallthrough
CT: control target
= control target key end

     0   :  { %s3267_s24 = smov 0   ;;  %s3818_s0 = inlined_call_operand.vmem [shape: f32[2,4,32], index: 0, kind: input, shape index: {}]   ;;  %s3819_s1 = inlined_call_operand.vmem [shape: f32[2,16,32], index: 1, kind: input, shape index: {}]   ;;  %s3820_s2 = inlined_call_operand.vmem [shape: f32[4,32], index: 2, kind: input, shape index: {}]   ;;  %s3821_s3 = inlined_call_operand.vmem [shape: f32[7,32], index: 3, kind: input, shape index: {}]   ;;  %s3822_s4 = inlined_call_operand.vmem [shape: f32[608,32], index: 4, kind: input, shape index: {}]   ;;  %s3823_s5 = inlined_call_operand.vmem [shape: f32[72,64], index: 5, kind: input, shape index: {}]   ;;  %s3824_s6 = inlined_call_operand.vmem [shape: f32[40,128], index: 6, kind: input, shape index: {}]   ;;  %s3825_s7 = inlined_call_operand.vmem [shape: f32[2,7,128], index: 7, kind: output, shape index: {}]  }
   0x1 LB: > { %s2607_s25 = sadd.s32 4294967295, %s3220_s24   ;;  %p2611_p0 = scmp.ge.s32.totalorder %s3220_s24, 1  ;;  %s3220_s24 = sphi %s3267_s24, %s17_s24  }
   0x2   : > { %p246_p1 = scmp.lt.s32.totalorder %s3220_s24, 3 }
   0x4   : > { %p247_p2 = pnand %p2611_p0, %p246_p1 }
   0x5   : > { %v383_v0 = vld [vmem:[%s3822_s4 + $0x20] sm:$0xff] (!%p247_p2)  ;;  %v384_v1 = vld [vmem:[%s3822_s4 + $0x28] sm:$0xff] (!%p247_p2)  ;;  %v3222_v3 = vmov (!%p247_p2), 0.0|0.0   ;;  %v385_v6 = vld [vmem:[%s3822_s4 + $0x30] sm:$0xff] (!%p247_p2)  ;;  %p281_p3 = scmp.lt.s32.totalorder (!%p247_p2), %s2607_s25, 1  ;;  %vm3223_vm0 = vmmov (!%p247_p2), 0  }
   0x6   : > { %250 = sbr.rel (%p247_p2) target bundleno = 5988 (0x1764), region = 48  ;;  %v300_v2 = vld [vmem:[%s3822_s4] sm:$0xff] (!%p247_p2)  ;;  %3053 = vmatprep.subr.bf16.mxu1 (!%p247_p2), %v3222_v3  ;;  %v3054_v4 = vpack.c.bf16 (!%p247_p2), %v384_v1, %v383_v0  ;;  %3047 = vmatprep.subr.bf16.mxu0 (!%p247_p2), %v3222_v3  ;;  %v301_v5 = vld [vmem:[%s3822_s4 + $0x8] sm:$0xff] (!%p247_p2)  ;;  %v386_v7 = vld [vmem:[%s3822_s4 + $0x38] sm:$0xff] (!%p247_p2)  ;;  %v3224_v11 = vmov (!%p247_p2), 0.0   ;;  %vm309_vm1 = vcmask (!%p247_p2), 261120  }
   0x7   : > { %v3048_v8 = vpack.c.bf16 (!%p247_p2), %v301_v5, %v300_v2  ;;  %v302_v9 = vld [vmem:[%s3822_s4 + $0x10] sm:$0xff] (!%p247_p2)  ;;  %v303_v10 = vld [vmem:[%s3822_s4 + $0x18] sm:$0xff] (!%p247_p2)  ;;  %2811 = vmatprep.mubr.msk.f32.mxu1 (!%p247_p2), %vm3223_vm0, %v3224_v11  ;;  %2800 = vmatprep.mubr.msk.f32.mxu0 (!%p247_p2), %vm3223_vm0, %v3224_v11  ;;  %v3057_v12 = vpack.c.bf16 (!%p247_p2), %v386_v7, %v385_v6  ;;  %v3313_v14 = vld [vmem:[%s3820_s2] sm:$0xf] (!%p247_p2)  ;;  %vm621_vm2 = vcmask (!%p247_p2), 27648   ;;  %vm637_vm3 = vcmask (!%p247_p2), 1043456  }
   0x8   : > { %3055 = vmatpush3.bf16.msra.mxu1 (!%p247_p2), %v3054_v4  ;;  %v3051_v13 = vpack.c.bf16 (!%p247_p2), %v303_v10, %v302_v9  ;;  %v2618_v17 = vld [vmem:[%s3822_s4 + $0x241] ss:$0 sm:$0xff] (!%p247_p2)  ;;  %v2616_v18 = vld [vmem:[%s3822_s4 + $0x240] ss:$0 sm:$0xff] (!%p247_p2)  ;;  %v463_v26 = vld [vmem:[%s3822_s4 + $0x48] sm:$0xff] (!%p247_p2)  ;;  %vm633_vm4 = vcmask (!%p247_p2), 31744  }
   0x9   : > { %3049 = vmatpush3.bf16.msra.mxu0 (!%p247_p2), %v3048_v8  ;;  %3056 = vmatprep.subr.bf16.mxu1 (!%p247_p2), %v3222_v3  ;;  %v462_v25 = vld [vmem:[%s3822_s4 + $0x40] sm:$0xff] (!%p247_p2)  ;;  %v464_v27 = vld [vmem:[%s3822_s4 + $0x50] sm:$0xff] (!%p247_p2)  ;;  %v465_v29 = vld [vmem:[%s3822_s4 + $0x58] sm:$0xff] (!%p247_p2)  ;;  %vm794_vm5 = vcmask (!%p247_p2), 257024   ;;  %vm917_vm6 = vcmask (!%p247_p2), 523264   ;;  %vm1523_vm8 = vcmask (!%p247_p2), 1046528  }
   0xa   : > { %3050 = vmatprep.subr.bf16.mxu0 (!%p247_p2), %v3222_v3  ;;  %v3060_v28 = vpack.c.bf16 (!%p247_p2), %v463_v26, %v462_v25  ;;  %v3063_v30 = vpack.c.bf16 (!%p247_p2), %v465_v29, %v464_v27  ;;  %v2620_v41 = vld [vmem:[%s3822_s4 + $0x242] ss:$0 sm:$0xff] (!%p247_p2)  ;;  %v712_v45 = vld [vmem:[%s3822_s4 + $0x68] sm:$0xff] (!%p247_p2)  ;;  %v713_v46 = vld [vmem:[%s3822_s4 + $0x70] sm:$0xff] (!%p247_p2)  ;;  %vm1507_vm9 = vcmask (!%p247_p2), 55296   ;;  %vm1519_vm10 = vcmask (!%p247_p2), 56320  }
   0xb   : > { %v711_v44 = vld [vmem:[%s3822_s4 + $0x60] sm:$0xff] (!%p247_p2)  ;;  %v714_v48 = vld [vmem:[%s3822_s4 + $0x78] sm:$0xff] (!%p247_p2)  ;;  %v822_v4 = vld [vmem:[%s3823_s5 + $0x8] sm:$0xff] (!%p247_p2)  ;;  %vm1680_vm11 = vcmask (!%p247_p2), 260096   ;;  %vm2031_vm12 = vcmask (!%p247_p2), 30720   ;;  %vm2504_vm13 = vcmask (!%p247_p2), 14336  }
   0xc   : > { %3058 = vmatpush3.bf16.msra.mxu1 (!%p247_p2), %v3057_v12  ;;  %v3066_v47 = vpack.c.bf16 (!%p247_p2), %v712_v45, %v711_v44  ;;  %v3069_v49 = vpack.c.bf16 (!%p247_p2), %v714_v48, %v713_v46  ;;  %v2626_v55 = vld [vmem:[%s3822_s4 + $0x243] ss:$0 sm:$0xff] (!%p247_p2)  ;;  %v823_v6 = vld [vmem:[%s3823_s5 + $0x10] sm:$0xff] (!%p247_p2)  ;;  %v824_v7 = vld [vmem:[%s3823_s5 + $0x18] sm:$0xff] (!%p247_p2)  ;;  %s3225_s17 = smov (!%p247_p2), 123   ;;  %vm2529_vm14 = vcmask (!%p247_p2), 1045504  }
   0xd   : > { %s3827_s25 = smov (!%p281_p3, %s2607_s25), 1  ;;  %3052 = vmatpush3.bf16.msra.mxu0 %v3051_v13  ;;  %2825 = vmatprep.subr.mxu1 %v3224_v11  ;;  %v821_v2 = vld [vmem:[%s3823_s5] sm:$0xff]  ;;  %v3075_v8 = vpack.c.bf16 %v824_v7, %v823_v6  ;;  %v905_v10 = vld [vmem:[%s3822_s4 + $0x88] sm:$0xff]  ;;  %v906_v12 = vld [vmem:[%s3822_s4 + $0x90] sm:$0xff]  ;;  %s3226_s18 = smov 2   ;;  %vm2540_vm15 = vcmask 38928  }
   0xe   : > { %s2612_s19 = sshll.u32 %s3827_s25, 2  ;;  %3059 = vmatprep.subr.bf16.mxu0 %v3222_v3  ;;  %v3072_v5 = vpack.c.bf16 %v822_v4, %v821_v2  ;;  %v904_v9 = vld [vmem:[%s3822_s4 + $0x80] sm:$0xff]  ;;  %v1018_v27 = vld [vmem:[%s3822_s4 + $0xc8] sm:$0xff]  ;;  %s2676_s14 = sshll.u32 %s3827_s25, 4  ;;  %v911_v44 = vld [vmem:[%s3822_s4 + $0xb8] sm:$0xff] }
   0xf   : > { %s284_s26 = scalar_lea.vmem %s3818_s0, %s2612_s19  ;;  %v3078_v13 = vpack.c.bf16 %v905_v10, %v904_v9  ;;  %v1017_v26 = vld [vmem:[%s3822_s4 + $0xc0] sm:$0xff]  ;;  %s3449_s21 = scalar_lea.vmem %s3819_s1, %s2676_s14 }
  0x10   : > { %v3318_v15 = vld [vmem:[%s284_s26] sm:$0xf]  ;;  %s2615_s19 = sshll.u32 %s3827_s25, 3 }
  0x11   : > { %v299_v16 = vadd.f32 %v3313_v14, %v3318_v15  ;;  %v1269_v46 = vld [vmem:[%s3822_s4 + $0x120] sm:$0xff]  ;;  %s293_s23 = scalar_lea.vmem %s3825_s7, %s2615_s19 }
  0x12   : > { %2538 = vst [vmem:[%s293_s23] sm:$0x7f] %v3224_v11 }
  0x13   : > { %2812 = vmatmul.mubr.msk.f32.vlgmr.msra.gmra.mrb[0].mxu1 %vm309_vm1, %v299_v16  ;;  %2801 = vmatmul.mubr.msk.f32.vlgmr.msra.gmra.mrb[0].mxu0 %vm309_vm1, %v299_v16 }
  0x14   : > { %2827 = vmatprep.mubr.msk.f32.mxu1 %vm3223_vm0, %v3224_v11  ;;  %2822 = vmatprep.mubr.msk.f32.mxu0 %vm3223_vm0, %v3224_v11 }
  0x15   : > { %3061 = vmatpush3.bf16.msra.mxu0 %v3060_v28  ;;  %v2629_v28 = vld [vmem:[%s3822_s4 + $0x246] ss:$0 sm:$0xff] }
  0x16   : > { %3062 = vmatprep.subr.bf16.mxu0 %v3222_v3 }
  0x19   : > { %3064 = vmatpush3.bf16.msra.mxu0 %v3063_v30  ;;  %v3090_v30 = vpack.c.bf16 %v1018_v27, %v1017_v26  ;;  %v2640_v26 = vld [vmem:[%s3822_s4 + $0x24c] ss:$0 sm:$0xff] }
  0x1a   : > { %3065 = vmatprep.subr.bf16.mxu0 %v3222_v3 }
  0x1c   : > { %2823 = vmatmul.mubr.msk.f32.vlgmr.msra.gmra.mrb[2].mxu0 %vm309_vm1, %v3318_v15 }
  0x1d   : > { %2843 = vmatprep.mubr.msk.f32.mxu0 %vm3223_vm0, %v3224_v11  ;;  %3067 = vmatpush3.bf16.msra.mxu0 %v3066_v47  ;;  %v1270_v47 = vld [vmem:[%s3822_s4 + $0x128] sm:$0xff] }
  0x1e   : > { %3068 = vmatprep.subr.bf16.mxu0 %v3222_v3  ;;  %v3108_v48 = vpack.c.bf16 %v1270_v47, %v1269_v46 }
  0x21   : > { %3070 = vmatpush3.bf16.msra.mxu0 %v3069_v49  ;;  %v1271_v49 = vld [vmem:[%s3822_s4 + $0x130] sm:$0xff] }
  0x22   : > { %3077 = vmatprep.subr.bf16.mxu0 %v3222_v3 }
  0xe6   : > { %v458_v19 = vpop.f32.mrb[0].mxu1  ;;  %v379_v22 = vpop.f32.mrb[0].mxu0 }
  0xe7   : > { %v459_v20 = vadd.f32 %v2618_v17, %v458_v19  ;;  %v2813_v21 = vpop.f32.mrb[1].mxu1  ;;  %v380_v23 = vadd.f32 %v2616_v18, %v379_v22  ;;  %v2802_v24 = vpop.f32.mrb[1].mxu0  ;;  %v908_v17 = vld [vmem:[%s3822_s4 + $0xa0] sm:$0xff]  ;;  %v909_v18 = vld [vmem:[%s3822_s4 + $0xa8] sm:$0xff] }
  0xe8   : > { %v3084_v19 = vpack.c.bf16 %v909_v18, %v908_v17  ;;  %v2628_v24 = vld [vmem:[%s3822_s4 + $0x245] ss:$0 sm:$0xff] }
  0xe9   : > { %2826 = vmatpush3.xpose.msk.msra.mxu1 %vm309_vm1, %v459_v20 }
  0xea   : > { %2830 = vmatprep.subr.mxu1 %v3224_v11 }
  0xec   : > { %2828 = vmatmul.mubr.msk.f32.vlgmr.msra.gmra.mrb[2].mxu1 %vm309_vm1, %v380_v23 }
  0xed   : > { %2832 = vmatprep.mubr.msk.f32.mxu1 %vm3223_vm0, %v3224_v11 }
  0xef   : > { %v540_v40 = vpop.f32.mrb[2].mxu0 }
  0xf0   : > { %v2824_v42 = vpop.f32.mrb[3].mxu0  ;;  %v541_v43 = vadd.f32 %v2620_v41, %v540_v40  ;;  %v1103_v40 = vld [vmem:[%s3822_s4 + $0xf0] sm:$0xff]  ;;  %v1104_v41 = vld [vmem:[%s3822_s4 + $0xf8] sm:$0xff] }
  0xf1   : > { %v3099_v42 = vpack.c.bf16 %v1104_v41, %v1103_v40  ;;  %v2632_v40 = vld [vmem:[%s3822_s4 + $0x244] ss:$0 sm:$0xff] }
  0xf2   : > { %2831 = vmatpush3.msk.msra.mxu1 %vm637_vm3, %v541_v43  ;;  %v910_v43 = vld [vmem:[%s3822_s4 + $0xb0] sm:$0xff] }
  0xf3   : > { %3071 = vmatprep.subr.bf16.mxu1 %v3222_v3  ;;  %v3087_v45 = vpack.c.bf16 %v911_v44, %v910_v43 }
 0x1bf   : > { %v616_v31 = vpop.f32.mrb[2].mxu1 }
 0x1c0   : > { %v620_v32 = vmul.f32 0.17677669, %v616_v31  ;;  %v2829_v33 = vpop.f32.mrb[3].mxu1 }
 0x1c1   : > { %v1020_v33 = vld [vmem:[%s3822_s4 + $0xd8] sm:$0xff] }
 0x1c2   : > { %v622_v34 = vsel %vm621_vm2, %v620_v32, -inf }
 0x1c3   : > { %623 = vmax.xlane.f32.xlu0 %v622_v34 }
 0x250   : > { %v624_v35 = vpop.xlane.xlu0 %623 }
 0x251   : > { %v625_v36 = vsub.f32 %v620_v32, %v624_v35  ;;  %v1019_v32 = vld [vmem:[%s3822_s4 + $0xd0] sm:$0xff]  ;;  %v3456_v35 = vld [vmem:[%s3449_s21] sm:$0xff] }
 0x252   : > { %v3093_v34 = vpack.c.bf16 %v1020_v33, %v1019_v32 }
 0x253   : > { %v626_v37 = vmul.f32 1.442695, %v625_v36  ;;  %v1101_v36 = vld [vmem:[%s3822_s4 + $0xe0] sm:$0xff] }
 0x255   : > { %3186 = vpow2.f32 %v626_v37  ;;  %v1102_v37 = vld [vmem:[%s3822_s4 + $0xe8] sm:$0xff] }
 0x25f   : > { %v3187_v38 = vpop.eup %3186 }
 0x260   : > { %v628_v39 = vsel %vm621_vm2, %v3187_v38, 0.0 }
 0x261   : > { %629 = vadd.xlane.f32.xlu0 %v628_v39  ;;  %v3096_v39 = vpack.c.bf16 %v1102_v37, %v1101_v36  ;;  %v2642_v36 = vld [vmem:[%s3822_s4 + $0x24d] ss:$0 sm:$0xff] }
 0x2ee   : > { %v630_v50 = vpop.xlane.xlu0 %629 }
 0x2ef   : > { %3188 = vrcp.f32 %v630_v50  ;;  %v1272_v50 = vld [vmem:[%s3822_s4 + $0x138] sm:$0xff] }
 0x2f9   : > { %v3189_v51 = vpop.eup %3188 }
 0x2fa   : > { %v632_v52 = vmul.f32 %v3189_v51, %v3187_v38  ;;  %v1023_v38 = vrot.slane %v3456_v35, 1  ;;  %v3111_v51 = vpack.c.bf16 %v1272_v50, %v1271_v49 }
 0x2fc   : > { %2833 = vmatmul.mubr.msk.f32.vlgmr.msra.gmra.mrb[4].mxu1 %vm633_vm4, %v632_v52  ;;  %v2630_v52 = vld [vmem:[%s3823_s5 + $0x40] ss:$0 sm:$0xff] }
 0x2fd   : > { %2854 = vmatprep.mubr.msk.f32.mxu1 %vm3223_vm0, %v3224_v11  ;;  %3073 = vmatpush3.bf16.msra.mxu1 %v3072_v5 }
 0x2fe   : > { %3074 = vmatprep.subr.bf16.mxu1 %v3222_v3 }
 0x301   : > { %3076 = vmatpush3.bf16.msra.mxu1 %v3075_v8  ;;  %v1105_v8 = vld [vmem:[%s3822_s4 + $0x24a] sm:$0x1] }
 0x302   : > { %3089 = vmatprep.subr.bf16.mxu1 %v3222_v3 }
 0x3cf   : > { %v707_v53 = vpop.f32.mrb[4].mxu1 }
 0x3d0   : > { %v2834_v54 = vpop.f32.mrb[5].mxu1  ;;  %2844 = vmatmul.mubr.msk.f32.vlgmr.msra.gmra.mrb[4].mxu0 %vm309_vm1, %v707_v53  ;;  %v1096_v53 = vlaneseq }
 0x3d1   : > { %2873 = vmatprep.mubr.msk.f32.mxu0 %vm3223_vm0, %v3224_v11  ;;  %3079 = vmatpush3.bf16.msra.mxu0 %v3078_v13  ;;  %v1187_v54 = vld [vmem:[%s3822_s4 + $0x100] sm:$0xff] }
 0x3d2   : > { %3080 = vmatprep.subr.bf16.mxu0 %v3222_v3  ;;  %v1348_v13 = vld [vmem:[%s3822_s4 + $0x140] sm:$0xff] }
 0x4a3   : > { %v789_v56 = vpop.f32.mrb[4].mxu0 }
 0x4a4   : > { %v790_v57 = vadd.f32 %v2626_v55, %v789_v56  ;;  %v2845_v58 = vpop.f32.mrb[5].mxu0  ;;  %v1188_v55 = vld [vmem:[%s3822_s4 + $0x108] sm:$0xff] }
 0x4a6   : > { %v793_v59 = vadd.f32 %v790_v57, %v3318_v15  ;;  %v907_v15 = vld [vmem:[%s3822_s4 + $0x98] sm:$0xff] }
 0x4a7   : > { %v3081_v16 = vpack.c.bf16 %v907_v15, %v906_v12  ;;  %v1349_v15 = vld [vmem:[%s3822_s4 + $0x148] sm:$0xff] }
 0x4a8   : > { %v795_v60 = vsel %vm794_vm5, %v793_v59, 0.0 }
 0x4a9   : > { %796 = vadd.xlane.f32.xlu1 %v795_v60  ;;  %3082 = vmatpush3.bf16.msra.mxu0 %v3081_v16  ;;  %v3540_v16 = vld [vmem:[%s3821_s3] sm:$0x7f] }
 0x4aa   : > { %3083 = vmatprep.subr.bf16.mxu0 %v3222_v3 }
 0x4ad   : > { %3085 = vmatpush3.bf16.msra.mxu0 %v3084_v19  ;;  %v3114_v19 = vpack.c.bf16 %v1349_v15, %v1348_v13  ;;  %v1791_v13 = vld [vmem:[%s3822_s4 + $0x1a8] sm:$0xff] }
 0x4ae   : > { %3086 = vmatprep.subr.bf16.mxu0 %v3222_v3  ;;  %v2635_v15 = vld [vmem:[%s3822_s4 + $0x248] ss:$0 sm:$0xff] }
 0x4b1   : > { %3088 = vmatpush3.bf16.msra.mxu0 %v3087_v45 }
 0x4b2   : > { %3101 = vmatprep.subr.bf16.mxu0 %v3222_v3 }
 0x536   : > { %v797_v61 = vpop.xlane.xlu1 %796 }
 0x537   : > { %v799_v62 = vmul.f32 0.03125, %v797_v61  ;;  %v1097_v61 = vshrl.u32 %v1096_v53, 7 }
 0x539   : > { %v800_v63 = vsub.f32 %v793_v59, %v799_v62  ;;  %v3102_v59 = vpack.c.bf16 %v1188_v55, %v1187_v54  ;;  %v1189_v62 = vld [vmem:[%s3822_s4 + $0x110] sm:$0xff]  ;;  %v1098_v2 = vsub.s32 0, %v1097_v61  ;;  %vm1180_vm7 = vcmp.eq.s32.totalorder %v1097_v61, 0  ;;  %v1600_v61 = vld [vmem:[%s3822_s4 + $0x178] sm:$0xff] }
 0x53b   : > { %v801_v0 = vmul.f32 %v800_v63, %v800_v63 }
 0x53d   : > { %v802_v1 = vsel %vm794_vm5, %v801_v0, 0.0  ;;  %v1021_v0 = vld [vmem:[%s3822_s4 + $0x249] sm:$0x1] }
 0x53e   : > { %803 = vadd.xlane.f32.xlu1 %v802_v1 }
 0x5cb   : > { %v804_v20 = vpop.xlane.xlu1 %803 }
 0x5cc   : > { %v805_v21 = vmul.f32 0.03125, %v804_v20 }
 0x5ce   : > { %v806_v22 = vadd.f32 1e-05, %v805_v21  ;;  %v1350_v21 = vld [vmem:[%s3822_s4 + $0x150] sm:$0xff] }
 0x5d0   : > { %3190 = vrsqrt.f32 %v806_v22  ;;  %v1351_v22 = vld [vmem:[%s3822_s4 + $0x158] sm:$0xff] }
 0x5da   : > { %v3191_v23 = vpop.eup %3190 }
 0x5db   : > { %v808_v25 = vmul.f32 %v3191_v23, %v800_v63  ;;  %v1190_v63 = vld [vmem:[%s3822_s4 + $0x118] sm:$0xff]  ;;  %v3117_v23 = vpack.c.bf16 %v1351_v22, %v1350_v21 }
 0x5dc   : > { %v3105_v1 = vpack.c.bf16 %v1190_v63, %v1189_v62 }
 0x5dd   : > { %v814_v29 = vmul.f32 %v2628_v24, %v808_v25 }
 0x5df   : > { %v3438_v31 = vadd.f32 %v2629_v28, %v814_v29  ;;  %v2638_v29 = vld [vmem:[%s3822_s4 + $0x24b] ss:$0 sm:$0xff] }
 0x5e1   : > { %2855 = vmatmul.mubr.msk.f32.vlgmr.msra.gmra.mrb[6].mxu1 %vm309_vm1, %v3438_v31 }
 0x5e2   : > { %3091 = vmatpush3.bf16.msra.mxu1 %v3090_v30  ;;  %2884 = vmatprep.mubr.msk.f32.mxu1 %vm3223_vm0, %v3224_v11 }
 0x5e3   : > { %3092 = vmatprep.subr.bf16.mxu1 %v3222_v3 }
 0x5e6   : > { %3094 = vmatpush3.bf16.msra.mxu1 %v3093_v34 }
 0x5e7   : > { %3095 = vmatprep.subr.bf16.mxu1 %v3222_v3 }
 0x5e9   : > { %2885 = vmatmul.mubr.msk.f32.vlgmr.msra.gmra.mrb[8].mxu1 %vm309_vm1, %v1023_v38 }
 0x5ea   : > { %3097 = vmatpush3.bf16.msra.mxu1 %v3096_v39  ;;  %2895 = vmatprep.mubr.msk.f32.mxu1 %vm3223_vm0, %v3224_v11 }
 0x5eb   : > { %3098 = vmatprep.subr.bf16.mxu1 %v3222_v3 }
 0x5ee   : > { %3100 = vmatpush3.bf16.msra.mxu1 %v3099_v42 }
 0x5ef   : > { %3107 = vmatprep.subr.bf16.mxu1 %v3222_v3 }
 0x5f1   : > { %2896 = vmatmul.mubr.msk.f32.vlgmr.msra.gmra.mrb[10].mxu1 %vm309_vm1, %v3456_v35 }
 0x5f2   : > { %2917 = vmatprep.mubr.msk.f32.mxu1 %vm3223_vm0, %v3224_v11  ;;  %3109 = vmatpush3.bf16.msra.mxu1 %v3108_v48 }
 0x5f3   : > { %3110 = vmatprep.subr.bf16.mxu1 %v3222_v3 }
 0x5f6   : > { %3112 = vmatpush3.bf16.msra.mxu1 %v3111_v51 }
 0x5f7   : > { %2931 = vmatprep.subr.mxu1 %v3224_v11 }
 0x6b4   : > { %v899_v56 = vpop.f32.mrb[6].mxu1 }
 0x6b5   : > { %v900_v57 = vadd.f32 %v2630_v52, %v899_v56  ;;  %v2856_v58 = vpop.f32.mrb[7].mxu1 }
 0x6b6   : > { %v1598_v58 = vld [vmem:[%s3822_s4 + $0x168] sm:$0xff] }
 0x6b7   : > { %v903_v60 = vmax.f32 %v900_v57, 0.0 }
 0x6b9   : > { %2874 = vmatmul.mubr.msk.f32.vlgmr.msra.gmra.mrb[6].mxu0 %vm917_vm6, %v903_v60 }
 0x6ba   : > { %3103 = vmatpush3.bf16.msra.mxu0 %v3102_v59  ;;  %2906 = vmatprep.mubr.msk.f32.mxu0 %vm3223_vm0, %v3224_v11  ;;  %v1599_v59 = vld [vmem:[%s3822_s4 + $0x170] sm:$0xff] }
 0x6bb   : > { %3104 = vmatprep.subr.bf16.mxu0 %v3222_v3  ;;  %v3123_v62 = vpack.c.bf16 %v1600_v61, %v1599_v59  ;;  %v2652_v61 = vld [vmem:[%s3822_s4 + $0x24f] ss:$0 sm:$0xff] }
 0x6bc   : > { %v1092_v4 = vpop.f32.mrb[8].mxu1 }
 0x6bd   : > { %v1093_v5 = vadd.f32 %v1092_v4, %v1021_v0  ;;  %v2886_v6 = vpop.f32.mrb[9].mxu1 }
 0x6be   : > { %3106 = vmatpush3.bf16.msra.mxu0 %v3105_v1 }
 0x6bf   : > { %v3525_v7 = vrot.slane %v1093_v5, %v1098_v2  ;;  %3113 = vmatprep.subr.bf16.mxu0 %v3222_v3 }
 0x6c4   : > { %v1174_v9 = vpop.f32.mrb[10].mxu1 }
 0x6c5   : > { %v1175_v10 = vadd.f32 %v1174_v9, %v1105_v8  ;;  %v2897_v12 = vpop.f32.mrb[11].mxu1  ;;  %v2634_v9 = vld [vmem:[%s3822_s4 + $0x247] ss:$0 sm:$0xff] }
 0x6c6   : > { %v1790_v12 = vld [vmem:[%s3822_s4 + $0x1a0] sm:$0xff] }
 0x6c7   : > { %v1184_v17 = vrot.slane %v1175_v10, %v1098_v2 }
 0x6c9   : > { %v3542_v18 = vsel %vm1180_vm7, %v1184_v17, 0.0  ;;  %v3132_v17 = vpack.c.bf16 %v1791_v13, %v1790_v12 }
 0x6ca   : > { %v1186_v20 = vadd.f32 %v3542_v18, %v3540_v16 }
 0x6cc   : > { %2907 = vmatmul.mubr.msk.f32.vlgmr.msra.gmra.mrb[8].mxu0 %vm309_vm1, %v1186_v20  ;;  %2918 = vmatmul.mubr.msk.f32.vlgmr.msra.gmra.mrb[12].mxu1 %vm309_vm1, %v1186_v20  ;;  %v1793_v20 = vld [vmem:[%s3822_s4 + $0x1b8] sm:$0xff] }
 0x6cd   : > { %3115 = vmatpush3.bf16.msra.mxu0 %v3114_v19  ;;  %2928 = vmatprep.mubr.msk.f32.mxu0 %vm3223_vm0, %v3224_v11  ;;  %v1792_v19 = vld [vmem:[%s3822_s4 + $0x1b0] sm:$0xff] }
 0x6ce   : > { %3116 = vmatprep.subr.bf16.mxu0 %v3222_v3  ;;  %2933 = vmatprep.mubr.msk.f32.mxu1 %vm3223_vm0, %v3224_v11 }
 0x6d1   : > { %3118 = vmatpush3.bf16.msra.mxu0 %v3117_v23 }
 0x6d2   : > { %3119 = vmatprep.subr.bf16.mxu0 %v3222_v3 }
 0x6d4   : > { %2929 = vmatmul.mubr.msk.f32.vlgmr.msra.gmra.mrb[10].mxu0 %vm309_vm1, %v3542_v18 }
 0x6d5   : > { %2949 = vmatprep.mubr.msk.f32.mxu0 %vm3223_vm0, %v3224_v11 }
 0x78c   : > { %v987_v24 = vpop.f32.mrb[6].mxu0 }
 0x78d   : > { %v2875_v25 = vpop.f32.mrb[7].mxu0  ;;  %v988_v41 = vadd.f32 %v2632_v40, %v987_v24  ;;  %v3135_v24 = vpack.c.bf16 %v1793_v20, %v1792_v19  ;;  %v1707_v40 = vld [vmem:[%s3822_s4 + $0x180] sm:$0xff] }
 0x78e   : > { %v2119_v20 = vld [vmem:[%s3822_s4 + $0x1e0] sm:$0xff] }
 0x78f   : > { %v991_v46 = vadd.f32 %v988_v41, %v3438_v31  ;;  %v1597_v31 = vld [vmem:[%s3822_s4 + $0x160] sm:$0xff] }
 0x790   : > { %v3120_v60 = vpack.c.bf16 %v1598_v58, %v1597_v31  ;;  %v1874_v31 = vld [vmem:[%s3822_s4 + $0x1d0] sm:$0xff]  ;;  %v1875_v58 = vld [vmem:[%s3822_s4 + $0x1d8] sm:$0xff] }
 0x791   : > { %v992_v47 = vsel %vm794_vm5, %v991_v46, 0.0  ;;  %v3141_v59 = vpack.c.bf16 %v1875_v58, %v1874_v31 }
 0x792   : > { %3121 = vmatpush3.bf16.msra.mxu0 %v3120_v60 }
 0x793   : > { %3122 = vmatprep.subr.bf16.mxu0 %v3222_v3 }
 0x796   : > { %3124 = vmatpush3.bf16.msra.mxu0 %v3123_v62 }
 0x797   : > { %3131 = vmatprep.subr.bf16.mxu0 %v3222_v3 }
 0x79f   : > { %v1265_v27 = vpop.f32.mrb[8].mxu0  ;;  %v1344_v28 = vpop.f32.mrb[12].mxu1 }
 0x7a0   : > { %v1345_v30 = vadd.f32 %v2640_v26, %v1344_v28  ;;  %v2908_v32 = vpop.f32.mrb[9].mxu0  ;;  %v2919_v33 = vpop.f32.mrb[13].mxu1  ;;  %v1266_v34 = vadd.f32 %v2638_v29, %v1265_v27  ;;  %v2648_v27 = vld [vmem:[%s3822_s4 + $0x24e] ss:$0 sm:$0xff] }
 0x7a2   : > { %2932 = vmatpush3.xpose.msk.msra.mxu1 %vm309_vm1, %v1345_v30 }
 0x7a3   : > { %2936 = vmatprep.subr.mxu1 %v3224_v11 }
 0x7a5   : > { %2934 = vmatmul.mubr.msk.f32.vlgmr.msra.gmra.mrb[14].mxu1 %vm309_vm1, %v1266_v34 }
 0x7a6   : > { %2938 = vmatprep.mubr.msk.f32.mxu1 %vm3223_vm0, %v3224_v11 }
 0x7a7   : > { %v1426_v37 = vpop.f32.mrb[10].mxu0 }
 0x7a8   : > { %v1427_v38 = vadd.f32 %v2642_v36, %v1426_v37  ;;  %v2930_v39 = vpop.f32.mrb[11].mxu0 }
 0x7aa   : > { %2937 = vmatpush3.msk.msra.mxu1 %vm1523_vm8, %v1427_v38 }
 0x7ab   : > { %3125 = vmatprep.subr.bf16.mxu1 %v3222_v3 }
 0x878   : > { %v1502_v42 = vpop.f32.mrb[14].mxu1 }
 0x879   : > { %v1506_v43 = vmul.f32 0.17677669, %v1502_v42  ;;  %v2935_v44 = vpop.f32.mrb[15].mxu1  ;;  %v1709_v42 = vld [vmem:[%s3822_s4 + $0x190] sm:$0xff] }
 0x87b   : > { %v1508_v45 = vsel %vm1507_vm9, %v1506_v43, -inf }
 0x87c   : > { %1509 = vmax.xlane.f32.xlu0 %v1508_v45 }
 0x880   : > { %993 = vadd.xlane.f32.xlu0 %v992_v47 }
 0x909   : > { %v1510_v48 = vpop.xlane.xlu0 %1509 }
 0x90a   : > { %v1511_v49 = vsub.f32 %v1506_v43, %v1510_v48  ;;  %v1710_v43 = vld [vmem:[%s3822_s4 + $0x198] sm:$0xff] }
 0x90b   : > { %v3129_v44 = vpack.c.bf16 %v1710_v43, %v1709_v42  ;;  %v2228_v42 = vld [vmem:[%s3823_s5 + $0x28] sm:$0xff] }
 0x90c   : > { %v1512_v50 = vmul.f32 1.442695, %v1511_v49  ;;  %v2650_v49 = vld [vmem:[%s3822_s4 + $0x254] ss:$0 sm:$0xff] }
 0x90d   : > { %v994_v51 = vpop.xlane.xlu0 %993 }
 0x90e   : > { %3192 = vpow2.f32 %v1512_v50  ;;  %v995_v52 = vmul.f32 0.03125, %v994_v51  ;;  %v2651_v51 = vld [vmem:[%s3822_s4 + $0x255] ss:$0 sm:$0xff] }
 0x910   : > { %v996_v53 = vsub.f32 %v991_v46, %v995_v52 }
 0x912   : > { %v997_v54 = vmul.f32 %v996_v53, %v996_v53 }
 0x914   : > { %v998_v55 = vsel %vm794_vm5, %v997_v54, 0.0  ;;  %v1873_v54 = vld [vmem:[%s3822_s4 + $0x1c8] sm:$0xff] }
 0x915   : > { %999 = vadd.xlane.f32.xlu0 %v998_v55 }
 0x918   : > { %v3193_v56 = vpop.eup %3192 }
 0x919   : > { %v1514_v57 = vsel %vm1507_vm9, %v3193_v56, 0.0 }
 0x91a   : > { %1515 = vadd.xlane.f32.xlu1 %v1514_v57 }
 0x9a2   : > { %v1000_v2 = vpop.xlane.xlu0 %999 }
 0x9a3   : > { %v1001_v4 = vmul.f32 0.03125, %v1000_v2 }
 0x9a5   : > { %v1002_v5 = vadd.f32 1e-05, %v1001_v4 }
 0x9a7   : > { %v1516_v63 = vpop.xlane.xlu1 %1515 }
 0x9a8   : > { %3194 = vrcp.f32 %v1516_v63 }
 0x9a9   : > { %3196 = vrsqrt.f32 %v1002_v5 }
 0x9b2   : > { %v3195_v0 = vpop.eup %3194 }
 0x9b3   : > { %v1518_v1 = vmul.f32 %v3195_v0, %v3193_v56  ;;  %v3197_v6 = vpop.eup %3196 }
 0x9b4   : > { %v1004_v8 = vmul.f32 %v3197_v6, %v996_v53  ;;  %v1872_v53 = vld [vmem:[%s3822_s4 + $0x1c0] sm:$0xff] }
 0x9b5   : > { %2939 = vmatmul.mubr.msk.f32.vlgmr.msra.gmra.mrb[16].mxu1 %vm1519_vm10, %v1518_v1  ;;  %v3138_v56 = vpack.c.bf16 %v1873_v54, %v1872_v53  ;;  %v2656_v1 = vld [vmem:[%s3822_s4 + $0x251] ss:$0 sm:$0xff]  ;;  %v2314_v53 = vld [vmem:[%s3822_s4 + $0x220] sm:$0xff]  ;;  %v2315_v54 = vld [vmem:[%s3822_s4 + $0x228] sm:$0xff] }
 0x9b6   : > { %2960 = vmatprep.mubr.msk.f32.mxu1 %vm3223_vm0, %v3224_v11  ;;  %v1010_v10 = vmul.f32 %v2634_v9, %v1004_v8 }
 0x9b8   : > { %v1016_v21 = vadd.f32 %v2635_v15, %v1010_v10 }
 0x9ba   : > { %v1100_v25 = vadd.f32 %v3525_v7, %v1016_v21  ;;  %v2120_v21 = vld [vmem:[%s3822_s4 + $0x1e8] sm:$0xff] }
 0x9bc   : > { %v1789_v26 = vadd.f32 %v1100_v25, %v3313_v14 }
 0xa88   : > { %v1593_v22 = vpop.f32.mrb[16].mxu1 }
 0xa89   : > { %v2940_v23 = vpop.f32.mrb[17].mxu1  ;;  %2950 = vmatmul.mubr.msk.f32.vlgmr.msra.gmra.mrb[12].mxu0 %vm309_vm1, %v1593_v22  ;;  %v2121_v22 = vld [vmem:[%s3822_s4 + $0x1f0] sm:$0xff] }
 0xa8a   : > { %3133 = vmatpush3.bf16.msra.mxu0 %v3132_v17  ;;  %2971 = vmatprep.mubr.msk.f32.mxu0 %vm3223_vm0, %v3224_v11  ;;  %v3144_v23 = vpack.c.bf16 %v2120_v21, %v2119_v20 }
 0xa8b   : > { %3134 = vmatprep.subr.bf16.mxu0 %v3222_v3 }
 0xa8e   : > { %3136 = vmatpush3.bf16.msra.mxu0 %v3135_v24  ;;  %v2122_v24 = vld [vmem:[%s3822_s4 + $0x1f8] sm:$0xff] }
 0xa8f   : > { %3143 = vmatprep.subr.bf16.mxu0 %v3222_v3 }
 0xa91   : > { %2972 = vmatmul.mubr.msk.f32.vlgmr.msra.gmra.mrb[14].mxu0 %vm309_vm1, %v1789_v26 }
 0xa92   : > { %3003 = vmatprep.mubr.msk.f32.mxu0 %vm3223_vm0, %v3224_v11  ;;  %3145 = vmatpush3.bf16.msra.mxu0 %v3144_v23 }
 0xa93   : > { %3146 = vmatprep.subr.bf16.mxu0 %v3222_v3 }
 0xb5c   : > { %v1675_v28 = vpop.f32.mrb[12].mxu0 }
 0xb5d   : > { %v1676_v29 = vadd.f32 %v2648_v27, %v1675_v28  ;;  %v2951_v30 = vpop.f32.mrb[13].mxu0 }
 0xb5f   : > { %v1679_v7 = vadd.f32 %v1676_v29, %v3542_v18  ;;  %v1708_v18 = vld [vmem:[%s3822_s4 + $0x188] sm:$0xff] }
 0xb60   : > { %v3126_v41 = vpack.c.bf16 %v1708_v18, %v1707_v40 }
 0xb61   : > { %v1681_v32 = vsel %vm1680_vm11, %v1679_v7, 0.0 }
 0xb62   : > { %1682 = vadd.xlane.f32.xlu1 %v1681_v32  ;;  %3127 = vmatpush3.bf16.msra.mxu1 %v3126_v41  ;;  %v2227_v41 = vld [vmem:[%s3823_s5 + $0x20] sm:$0xff] }
 0xb63   : > { %3128 = vmatprep.subr.bf16.mxu1 %v3222_v3  ;;  %v3150_v43 = vpack.c.bf16 %v2228_v42, %v2227_v41 }
 0xb64   : > { %v1868_v14 = vpop.f32.mrb[14].mxu0 }
 0xb65   : > { %v2973_v33 = vpop.f32.mrb[15].mxu0 }
 0xb66   : > { %3130 = vmatpush3.bf16.msra.mxu1 %v3129_v44  ;;  %v2229_v44 = vld [vmem:[%s3823_s5 + $0x30] sm:$0xff] }
 0xb67   : > { %3137 = vmatprep.subr.bf16.mxu1 %v3222_v3 }
 0xbef   : > { %v1683_v34 = vpop.xlane.xlu1 %1682 }
 0xbf0   : > { %v1684_v36 = vmul.f32 0.03125, %v1683_v34 }
 0xbf2   : > { %v1685_v37 = vsub.f32 %v1679_v7, %v1684_v36  ;;  %v2662_v7 = vld [vmem:[%s3822_s4 + $0x252] ss:$0 sm:$0xff] }
 0xbf4   : > { %v1686_v38 = vmul.f32 %v1685_v37, %v1685_v37 }
 0xbf6   : > { %v1687_v39 = vsel %vm1680_vm11, %v1686_v38, 0.0 }
 0xbf7   : > { %1688 = vadd.xlane.f32.xlu1 %v1687_v39 }
 0xc84   : > { %v1689_v45 = vpop.xlane.xlu1 %1688 }
 0xc85   : > { %v1690_v46 = vmul.f32 0.03125, %v1689_v45  ;;  %v2230_v45 = vld [vmem:[%s3823_s5 + $0x38] sm:$0xff] }
 0xc87   : > { %v1691_v47 = vadd.f32 1e-05, %v1690_v46  ;;  %v3153_v46 = vpack.c.bf16 %v2230_v45, %v2229_v44 }
 0xc89   : > { %3198 = vrsqrt.f32 %v1691_v47  ;;  %v2310_v47 = vld [vmem:[%s3822_s4 + $0x200] sm:$0xff] }
 0xc93   : > { %v3199_v48 = vpop.eup %3198 }
 0xc94   : > { %v1693_v50 = vmul.f32 %v3199_v48, %v1685_v37  ;;  %v2311_v48 = vld [vmem:[%s3822_s4 + $0x208] sm:$0xff] }
 0xc96   : > { %v1699_v52 = vmul.f32 %v2650_v49, %v1693_v50  ;;  %v2312_v49 = vld [vmem:[%s3822_s4 + $0x210] sm:$0xff]  ;;  %v3156_v50 = vpack.c.bf16 %v2311_v48, %v2310_v47 }
 0xc98   : > { %v3663_v55 = vadd.f32 %v2651_v51, %v1699_v52  ;;  %v2313_v51 = vld [vmem:[%s3822_s4 + $0x218] sm:$0xff] }
 0xc99   : > { %v3159_v52 = vpack.c.bf16 %v2313_v51, %v2312_v49  ;;  %v298_v51 = vld [vmem:[%s3449_s21 + $0x8] sm:$0xff] }
 0xc9a   : > { %v1706_v57 = vadd.f32 %v3663_v55, %v3540_v16  ;;  %v2654_v16 = vld [vmem:[%s3822_s4 + $0x250] ss:$0 sm:$0xff] }
 0xc9b   : > { %v1869_v60 = vadd.f32 %v2654_v16, %v1868_v14 }
 0xc9c   : > { %2961 = vmatmul.mubr.msk.f32.vlgmr.msra.gmra.mrb[18].mxu1 %vm309_vm1, %v1706_v57 }
 0xc9d   : > { %3139 = vmatpush3.bf16.msra.mxu1 %v3138_v56  ;;  %2982 = vmatprep.mubr.msk.f32.mxu1 %vm3223_vm0, %v3224_v11 }
 0xc9e   : > { %3140 = vmatprep.subr.bf16.mxu1 %v3222_v3 }
 0xca1   : > { %3142 = vmatpush3.bf16.msra.mxu1 %v3141_v59  ;;  %v2664_v59 = vld [vmem:[%s3822_s4 + $0x256] ss:$0 sm:$0xff] }
 0xca2   : > { %2985 = vmatprep.subr.mxu1 %v3224_v11 }
 0xca4   : > { %2983 = vmatmul.mubr.msk.f32.vlgmr.msra.gmra.mrb[20].mxu1 %vm309_vm1, %v1100_v25  ;;  %v3147_v25 = vpack.c.bf16 %v2122_v24, %v2121_v22  ;;  %v2422_v24 = vld [vmem:[%s3824_s6] sm:$0xff] }
 0xca5   : > { %2987 = vmatprep.mubr.msk.f32.mxu1 %vm3223_vm0, %v3224_v11 }
 0xca6   : > { %3148 = vmatpush3.bf16.msra.mxu0 %v3147_v25  ;;  %v2423_v25 = vld [vmem:[%s3824_s6 + $0x8] sm:$0xff] }
 0xca7   : > { %3155 = vmatprep.subr.bf16.mxu0 %v3222_v3 }
 0xcaa   : > { %2986 = vmatpush3.xpose.msk.msra.mxu1 %vm309_vm1, %v1869_v60  ;;  %v2665_v60 = vld [vmem:[%s3822_s4 + $0x257] ss:$0 sm:$0xff] }
 0xcab   : > { %2990 = vmatprep.subr.mxu1 %v3224_v11 }
 0xd6f   : > { %v1785_v62 = vpop.f32.mrb[18].mxu1 }
 0xd70   : > { %v1786_v63 = vadd.f32 %v2652_v61, %v1785_v62  ;;  %v2962_v0 = vpop.f32.mrb[19].mxu1 }
 0xd71   : > { %v2317_v0 = vld [vmem:[%s3822_s4 + $0x238] sm:$0xff] }
 0xd72   : > { %2988 = vmatmul.mubr.msk.f32.vlgmr.msra.gmra.mrb[22].mxu1 %vm309_vm1, %v1786_v63  ;;  %v2316_v63 = vld [vmem:[%s3822_s4 + $0x230] sm:$0xff] }
 0xd73   : > { %2992 = vmatprep.mubr.msk.f32.mxu1 %vm3223_vm0, %v3224_v11 }
 0xd77   : > { %v1950_v2 = vpop.f32.mrb[20].mxu1 }
 0xd78   : > { %v1951_v4 = vadd.f32 %v2656_v1, %v1950_v2  ;;  %v2984_v5 = vpop.f32.mrb[21].mxu1  ;;  %v3165_v1 = vpack.c.bf16 %v2317_v0, %v2316_v63  ;;  %v2666_v2 = vld [vmem:[%s3823_s5 + $0x41] ss:$0 sm:$0xff] }
 0xd7a   : > { %2991 = vmatpush3.msk.msra.mxu1 %vm637_vm3, %v1951_v4 }
 0xd7b   : > { %3149 = vmatprep.subr.bf16.mxu1 %v3222_v3 }
 0xe45   : > { %v2026_v6 = vpop.f32.mrb[22].mxu1 }
 0xe46   : > { %v2030_v8 = vmul.f32 0.17677669, %v2026_v6  ;;  %v2989_v9 = vpop.f32.mrb[23].mxu1 }
 0xe47   : > { %v2668_v9 = vld [vmem:[%s3822_s4 + $0x253] ss:$0 sm:$0xff] }
 0xe48   : > { %v2032_v10 = vsel %vm2031_vm12, %v2030_v8, -inf }
 0xe49   : > { %2033 = vmax.xlane.f32.xlu0 %v2032_v10 }
 0xed6   : > { %v2034_v12 = vpop.xlane.xlu0 %2033 }
 0xed7   : > { %v2035_v13 = vsub.f32 %v2030_v8, %v2034_v12 }
 0xed9   : > { %v2036_v15 = vmul.f32 1.442695, %v2035_v13 }
 0xedb   : > { %3200 = vpow2.f32 %v2036_v15 }
 0xee5   : > { %v3201_v17 = vpop.eup %3200 }
 0xee6   : > { %v2038_v19 = vsel %vm2031_vm12, %v3201_v17, 0.0 }
 0xee7   : > { %2039 = vadd.xlane.f32.xlu1 %v2038_v19 }
 0xf74   : > { %v2040_v26 = vpop.xlane.xlu1 %2039 }
 0xf75   : > { %3202 = vrcp.f32 %v2040_v26  ;;  %v3168_v26 = vpack.c.bf16 %v2423_v25, %v2422_v24 }
 0xf7f   : > { %v3203_v27 = vpop.eup %3202 }
 0xf80   : > { %v2042_v28 = vmul.f32 %v3203_v27, %v3201_v17  ;;  %v2424_v27 = vld [vmem:[%s3824_s6 + $0x10] sm:$0xff] }
 0xf82   : > { %2993 = vmatmul.mubr.msk.f32.vlgmr.msra.gmra.mrb[24].mxu1 %vm633_vm4, %v2042_v28  ;;  %v2425_v28 = vld [vmem:[%s3824_s6 + $0x18] sm:$0xff] }
 0xf83   : > { %3014 = vmatprep.mubr.msk.f32.mxu1 %vm3223_vm0, %v3224_v11  ;;  %3151 = vmatpush3.bf16.msra.mxu1 %v3150_v43 }
 0xf84   : > { %3152 = vmatprep.subr.bf16.mxu1 %v3222_v3 }
 0xf87   : > { %3154 = vmatpush3.bf16.msra.mxu1 %v3153_v46 }
 0xf88   : > { %3167 = vmatprep.subr.bf16.mxu1 %v3222_v3 }
0x1055   : > { %v2115_v29 = vpop.f32.mrb[24].mxu1 }
0x1056   : > { %v2994_v30 = vpop.f32.mrb[25].mxu1  ;;  %3004 = vmatmul.mubr.msk.f32.vlgmr.msra.gmra.mrb[16].mxu0 %vm309_vm1, %v2115_v29  ;;  %v3171_v29 = vpack.c.bf16 %v2425_v28, %v2424_v27 }
0x1057   : > { %3033 = vmatprep.mubr.msk.f32.mxu0 %vm3223_vm0, %v3224_v11  ;;  %3157 = vmatpush3.bf16.msra.mxu0 %v3156_v50 }
0x1058   : > { %3158 = vmatprep.subr.bf16.mxu0 %v3222_v3 }
0x105b   : > { %3160 = vmatpush3.bf16.msra.mxu0 %v3159_v52 }
0x105c   : > { %3161 = vmatprep.subr.bf16.mxu0 %v3222_v3 }
0x1129   : > { %v2197_v32 = vpop.f32.mrb[16].mxu0 }
0x112a   : > { %v2198_v14 = vadd.f32 %v2662_v7, %v2197_v32  ;;  %v3005_v33 = vpop.f32.mrb[17].mxu0 }
0x112b   : > { %v2670_v33 = vld [vmem:[%s3822_s4 + $0x258] ss:$0 sm:$0xff] }
0x112c   : > { %v2201_v34 = vadd.f32 %v2198_v14, %v3663_v55  ;;  %v3162_v55 = vpack.c.bf16 %v2315_v54, %v2314_v53 }
0x112e   : > { %v2202_v36 = vsel %vm1680_vm11, %v2201_v34, 0.0  ;;  %3163 = vmatpush3.bf16.msra.mxu0 %v3162_v55 }
0x112f   : > { %2203 = vadd.xlane.f32.xlu0 %v2202_v36  ;;  %3164 = vmatprep.subr.bf16.mxu0 %v3222_v3  ;;  %v2671_v36 = vld [vmem:[%s3822_s4 + $0x259] ss:$0 sm:$0xff] }
0x1132   : > { %3166 = vmatpush3.bf16.msra.mxu0 %v3165_v1 }
0x11bc   : > { %v2204_v37 = vpop.xlane.xlu0 %2203 }
0x11bd   : > { %v2205_v38 = vmul.f32 0.03125, %v2204_v37 }
0x11bf   : > { %v2206_v39 = vsub.f32 %v2201_v34, %v2205_v38 }
0x11c1   : > { %v2207_v40 = vmul.f32 %v2206_v39, %v2206_v39 }
0x11c3   : > { %v2208_v18 = vsel %vm1680_vm11, %v2207_v40, 0.0 }
0x11c4   : > { %2209 = vadd.xlane.f32.xlu1 %v2208_v18 }
0x1251   : > { %v2210_v56 = vpop.xlane.xlu1 %2209 }
0x1252   : > { %v2211_v57 = vmul.f32 0.03125, %v2210_v56 }
0x1254   : > { %v2212_v31 = vadd.f32 1e-05, %v2211_v57 }
0x1256   : > { %3204 = vrsqrt.f32 %v2212_v31 }
0x1260   : > { %v3205_v58 = vpop.eup %3204 }
0x1261   : > { %v2214_v16 = vmul.f32 %v3205_v58, %v2206_v39 }
0x1263   : > { %v2220_v61 = vmul.f32 %v2664_v59, %v2214_v16 }
0x1265   : > { %v2226_v62 = vadd.f32 %v2665_v60, %v2220_v61 }
0x1267   : > { %3015 = vmatmul.mubr.msk.f32.vlgmr.msra.gmra.mrb[26].mxu1 %vm309_vm1, %v2226_v62 }
0x1268   : > { %3044 = vmatprep.mubr.msk.f32.mxu1 %vm3223_vm0, %v3224_v11  ;;  %3169 = vmatpush3.bf16.msra.mxu1 %v3168_v26 }
0x1269   : > { %3170 = vmatprep.subr.bf16.mxu1 %v3222_v3  ;;  %v2672_v3 = vld [vmem:[%s3824_s6 + $0x20] ss:$0 sm:$0xff] }
0x126c   : > { %3172 = vmatpush3.bf16.msra.mxu1 %v3171_v29 }
0x133a   : > { %v2305_v4 = vpop.f32.mrb[26].mxu1 }
0x133b   : > { %v2306_v5 = vadd.f32 %v2666_v2, %v2305_v4  ;;  %v3016_v6 = vpop.f32.mrb[27].mxu1 }
0x133d   : > { %v2309_v8 = vmax.f32 %v2306_v5, 0.0 }
0x133f   : > { %3034 = vmatmul.mubr.msk.f32.vlgmr.msra.gmra.mrb[18].mxu0 %vm917_vm6, %v2309_v8 }
0x1412   : > { %v2392_v10 = vpop.f32.mrb[18].mxu0 }
0x1413   : > { %v2393_v12 = vadd.f32 %v2668_v9, %v2392_v10  ;;  %v3035_v13 = vpop.f32.mrb[19].mxu0 }
0x1415   : > { %v2396_v15 = vadd.f32 %v2393_v12, %v2226_v62 }
0x1417   : > { %v2397_v17 = vsel %vm1680_vm11, %v2396_v15, 0.0 }
0x1418   : > { %2398 = vadd.xlane.f32.xlu0 %v2397_v17 }
0x14a5   : > { %v2399_v19 = vpop.xlane.xlu0 %2398 }
0x14a6   : > { %v2400_v20 = vmul.f32 0.03125, %v2399_v19 }
0x14a8   : > { %v2401_v21 = vsub.f32 %v2396_v15, %v2400_v20 }
0x14aa   : > { %v2402_v22 = vmul.f32 %v2401_v21, %v2401_v21 }
0x14ac   : > { %v2403_v23 = vsel %vm1680_vm11, %v2402_v22, 0.0 }
0x14ad   : > { %2404 = vadd.xlane.f32.xlu1 %v2403_v23 }
0x153a   : > { %v2405_v30 = vpop.xlane.xlu1 %2404 }
0x153b   : > { %v2406_v7 = vmul.f32 0.03125, %v2405_v30 }
0x153d   : > { %v2407_v32 = vadd.f32 1e-05, %v2406_v7 }
0x153f   : > { %3206 = vrsqrt.f32 %v2407_v32 }
0x1549   : > { %v3207_v14 = vpop.eup %3206 }
0x154a   : > { %v2409_v34 = vmul.f32 %v3207_v14, %v2401_v21 }
0x154c   : > { %v2415_v37 = vmul.f32 %v2670_v33, %v2409_v34 }
0x154e   : > { %v2421_v38 = vadd.f32 %v2671_v36, %v2415_v37 }
0x1550   : > { %3045 = vmatmul.mubr.msk.f32.vlgmr.msra.gmra.mrb[28].mxu1 %vm309_vm1, %v2421_v38 }
0x1623   : > { %v2500_v39 = vpop.f32.mrb[28].mxu1 }
0x1624   : > { %v2501_v40 = vadd.f32 %v2672_v3, %v2500_v39  ;;  %v3046_v18 = vpop.f32.mrb[29].mxu1 }
0x1626   : > { %v2505_v41 = vsel %vm2504_vm13, %v2501_v40, -inf  ;;  %v2517_v42 = vmul.f32 0.5, %v2501_v40 }
0x1627   : > { %2506 = vmax.xlane.f32.xlu0 %v2505_v41 }
0x1628   : > { %v2518_v43 = vmul.f32 1.442695, %v2517_v42 }
0x162a   : > { %3208 = vpow2.f32 %v2518_v43 }
0x1634   : > { %v3209_v44 = vpop.eup %3208 }
0x1635   : > { %v2521_v45 = vrot.slane %v3209_v44, 6 }
0x1637   : > { %2522 = vrot.lane.b32.xlu1 %v2521_v45, %s3225_s17 }
0x16a9   : > { %v2523_v52 = vpop.permute.xlu1 %2522 }
0x16aa   : > { %v2525_v53 = vmul.f32 %v2523_v52, %v3456_v35  ;;  %v2526_v54 = vmul.f32 %v2523_v52, %v298_v51 }
0x16ac   : > { %v2530_v55 = vrot.slane %v2525_v53, 2  ;;  %v2531_v56 = vrot.slane %v2526_v54, 2 }
0x16ae   : > { %v2532_v57 = vsel %vm2529_vm14, %v2530_v55, %v2531_v56 }
0x16b4   : > { %v2507_v46 = vpop.xlane.xlu0 %2506 }
0x16b5   : > { %v2508_v47 = vsub.f32 %v2501_v40, %v2507_v46 }
0x16b7   : > { %v2509_v48 = vmul.f32 1.442695, %v2508_v47 }
0x16b9   : > { %3210 = vpow2.f32 %v2509_v48 }
0x16c3   : > { %v3211_v49 = vpop.eup %3210 }
0x16c4   : > { %v2511_v50 = vsel %vm2504_vm13, %v3211_v49, 0.0 }
0x16c5   : > { %2512 = vadd.xlane.f32.xlu0 %v2511_v50 }
0x16db   : > { %2533 = vrot.lane.b32.xlu0 %v2532_v57, %s3226_s18 }
0x1752   : > { %v2513_v31 = vpop.xlane.xlu0 %2512 }
0x1753   : > { %3212 = vlog2.f32 %v2513_v31 }
0x1756   : > { %v2534_v58 = vpop.permute.xlu0 %2533 }
0x1757   : > { %v2536_v16 = vadd.f32 %v2534_v58, %v2501_v40 }
0x1759   : > { %v2537_v61 = vmax.f32 %v2536_v16, 0.0 }
0x175d   : > { %v3213_v59 = vpop.eup %3212 }
0x175e   : > { %v2515_v35 = vmul.f32 0.6931472, %v3213_v59 }
0x1760   : > { %v2516_v60 = vsub.f32 %v2508_v47, %v2515_v35 }
0x1762   : > { %2539 = vst.msk [vmem:[%s293_s23] sm:$0x7f] %vm2504_vm13, %v2516_v60 }
0x1763   : > { %2541 = vst.msk [vmem:[%s293_s23] sm:$0x7f] %vm2540_vm15, %v2537_v61 }
0x1764 PF: > { %s17_s24 = sadd.s32 1, %s3220_s24  }
0x1765   : > { %p14_p4 = scmp.ge.s32.totalorder %s17_s24, 4  }
0x1767   :  { %16 = sbr.rel (!%p14_p4) target bundleno = 1 (0x1), region = 81 }

</bundles_post_ra>
